<compile_context>
chip_gen: v7x
topology: tpu7x:2x2x1
jax: 0.10.0
libtpu: 0.0.40
codegen_flags: <defaults>
</compile_context>

<pallas_src>
import functools

import jax
import jax.numpy as jnp
from jax.experimental import pallas as pl
from jax.experimental.pallas import tpu as pltpu


def _pick_tile(total, candidates):
    """Largest candidate that evenly divides `total`, else `total` (full dim)."""
    for c in candidates:
        if total % c == 0:
            return c
    return total


# ---------------------------------------------------------------------------
# Pallas kernel 1: fused [patch-embed matmul (K-tiled, M-tiled) + bias
#                         + 1x1-conv head (512 -> 1, lane-padded to 128)]
#
#   grid = (M // tm, K // tk), K is the innermost reduction axis ("arbitrary"),
#   M tiles are "parallel" so megacore can split them.  A/W tiles are bf16 for
#   the MXU; accumulation and bias adds are f32.  The head is applied in the
#   last-K epilogue so the (M, 512) feature map never round-trips through HBM.
# ---------------------------------------------------------------------------
def _fused_patch_embed_head_kernel(a_ref, w1_ref, b1_ref, w2_ref, b2_ref,
                                   o_ref, acc_ref):
    k = pl.program_id(1)

    @pl.when(k == 0)
    def _():
        acc_ref[...] = jnp.zeros_like(acc_ref)

    acc_ref[...] += jnp.dot(a_ref[...], w1_ref[...],
                            preferred_element_type=jnp.float32)

    @pl.when(k == pl.num_programs(1) - 1)
    def _():
        feat = acc_ref[...] + b1_ref[...]                      # (tm, 512) f32
        pred = jnp.dot(feat.astype(jnp.bfloat16), w2_ref[...],
                       preferred_element_type=jnp.float32)     # (tm, 128) f32
        o_ref[...] = (pred + b2_ref[...]).astype(o_ref.dtype)


def fused_patch_embed_head(patches_bf16, w1_bf16, b1, w2, b2, *, head_pad=128):
    """patches: (M, K) bf16, w1: (K, N1) bf16, b1: (N1,) f32,
       w2: (N1, N2) f32, b2: (N2,) f32 -> (M, N2) f32."""
    M, K = patches_bf16.shape
    K2, N1 = w1_bf16.shape
    N1b, N2 = w2.shape
    assert K == K2 and N1 == N1b

    # Pad the 512->1 head to a lane-dense width so the output store is a full
    # unmasked vst instead of a masked (M, 1) partial store.
    w2p = jnp.zeros((N1, head_pad), jnp.float32).at[:, :N2].set(w2)
    b2p = jnp.zeros((head_pad,), jnp.float32).at[:N2].set(b2)

    tm = _pick_tile(M, (256, 128, 64, 32, 16, 8))
    tk = _pick_tile(K, (1024, 768, 512, 384, 256, 128))

    out = pl.pallas_call(
        _fused_patch_embed_head_kernel,
        out_shape=jax.ShapeDtypeStruct((M, head_pad), jnp.float32),
        grid_spec=pltpu.PrefetchScalarGridSpec(
            num_scalar_prefetch=0,
            grid=(M // tm, K // tk),
            in_specs=[
                pl.BlockSpec((tm, tk), lambda m, k: (m, k)),          # patches
                pl.BlockSpec((tk, N1), lambda m, k: (k, 0)),          # w_pe
                pl.BlockSpec((1, N1), lambda m, k: (0, 0)),           # b_pe
                pl.BlockSpec((N1, head_pad), lambda m, k: (0, 0)),    # w_out (padded)
                pl.BlockSpec((1, head_pad), lambda m, k: (0, 0)),     # b_out (padded)
            ],
            out_specs=pl.BlockSpec((tm, head_pad), lambda m, k: (m, 0)),
            scratch_shapes=[pltpu.VMEM((tm, N1), jnp.float32)],
        ),
        compiler_params=pltpu.CompilerParams(
            dimension_semantics=("parallel", "arbitrary")),
    )(patches_bf16, w1_bf16, b1.reshape(1, N1),
      w2p.astype(jnp.bfloat16), b2p.reshape(1, head_pad))

    return out[:, :N2]


# ---------------------------------------------------------------------------
# Pallas kernel 2: separable bilinear upsample, tiled over (batch, H_out tiles)
#   out[b, hi*tH:(hi+1)*tH, :] = Mh_tile @ pred[b] @ MwT
# Output rows are tiled (store-bound path bounded per step), W_out kept
# lane-dense / full width, both grid axes parallel for megacore.
# ---------------------------------------------------------------------------
def _bilinear_kernel(p_ref, mh_ref, mwT_ref, o_ref):
    p = p_ref[0]                                                        # (h, w)
    rows = jnp.dot(mh_ref[...], p, preferred_element_type=jnp.float32)  # (tH, w)
    o_ref[0] = jnp.dot(rows, mwT_ref[...],
                       preferred_element_type=jnp.float32)              # (tH, W_out)


def bilinear_upsample(pred, mh, mwT):
    """pred: (B, h, w), mh: (H_out, h), mwT: (w, W_out) -> (B, H_out, W_out)."""
    B, h, w = pred.shape
    H_out = mh.shape[0]
    W_out = mwT.shape[1]
    tH = _pick_tile(H_out, (256, 128, 64, 32, 16, 8))

    return pl.pallas_call(
        _bilinear_kernel,
        out_shape=jax.ShapeDtypeStruct((B, H_out, W_out), jnp.float32),
        grid_spec=pltpu.PrefetchScalarGridSpec(
            num_scalar_prefetch=0,
            grid=(B, H_out // tH),
            in_specs=[
                pl.BlockSpec((1, h, w), lambda b, i: (b, 0, 0)),
                pl.BlockSpec((tH, h), lambda b, i: (i, 0)),
                pl.BlockSpec((w, W_out), lambda b, i: (0, 0)),
            ],
            out_specs=pl.BlockSpec((1, tH, W_out), lambda b, i: (b, i, 0)),
        ),
        compiler_params=pltpu.CompilerParams(
            dimension_semantics=("parallel", "parallel")),
    )(pred, mh, mwT)


# ---------------------------------------------------------------------------
# Glue: PyTorch-compatible bilinear (align_corners=False) interpolation matrix
# (matches F.interpolate for upsampling; do not reuse for downsampling)
# ---------------------------------------------------------------------------
def bilinear_matrix(out_size, in_size):
    scale = in_size / out_size
    d = jnp.arange(out_size, dtype=jnp.float32)
    src = jnp.maximum((d + 0.5) * scale - 0.5, 0.0)
    i0 = jnp.minimum(jnp.floor(src).astype(jnp.int32), in_size - 1)
    i1 = jnp.minimum(i0 + 1, in_size - 1)
    w1 = jnp.clip(src - i0.astype(jnp.float32), 0.0, 1.0)
    w0 = 1.0 - w1
    m = (w0[:, None] * jax.nn.one_hot(i0, in_size, dtype=jnp.float32)
         + w1[:, None] * jax.nn.one_hot(i1, in_size, dtype=jnp.float32))
    return m


# ---------------------------------------------------------------------------
# Parameters (deterministic init — synthetic stand-in for the .pth checkpoint)
# ---------------------------------------------------------------------------
def init_params(in_ch=3, patch=32, feat_ch=512):
    kw = jax.random.PRNGKey(42)
    k1, k2, k3 = jax.random.split(kw, 3)
    k_pe = patch * patch * in_ch
    return {
        # proxy stride-32 patch embedding producing the x4 feature map
        "w_pe": (jax.random.normal(k1, (k_pe, feat_ch), jnp.float32)
                 * (1.0 / jnp.sqrt(k_pe))),
        "b_pe": jnp.zeros((feat_ch,), jnp.float32),
        # self.out = nn.Conv2d(512, 1, 1)  (1x1 conv == per-pixel matmul)
        "w_out": (jax.random.normal(k2, (feat_ch, 1), jnp.float32)
                  * (1.0 / jnp.sqrt(feat_ch))),
        "b_out": jax.random.normal(k3, (1,), jnp.float32) * 0.01,
    }


# ---------------------------------------------------------------------------
# Forward
# ---------------------------------------------------------------------------
@functools.partial(jax.jit, static_argnames=())
def backbone_forward(x_nchw, params):
    B, C, H, W = x_nchw.shape
    assert H % 32 == 0 and W % 32 == 0
    h, w = H // 32, W // 32
    M = B * h * w
    K = 32 * 32 * C

    # NCHW -> NHWC -> im2col into non-overlapping 32x32 patches (glue, bf16 to
    # halve the HBM traffic of the transpose).
    # TODO(synk): an in-kernel patch gather (BlockSpec over 32-row strips) would remove
    # this HBM-materialized transpose, but the C=3 lane layout does not reshape cleanly
    # inside Mosaic, so the im2col stays as wrapper glue.
    x = jnp.transpose(x_nchw, (0, 2, 3, 1)).astype(jnp.bfloat16)
    patches = (x.reshape(B, h, 32, w, 32, C)
                .transpose(0, 1, 3, 2, 4, 5)
                .reshape(M, K))

    # proxy backbone -> x4 features -> 1x1 conv head, fused in one Pallas kernel.
    pred = fused_patch_embed_head(
        patches,
        params["w_pe"].astype(jnp.bfloat16),
        params["b_pe"],
        params["w_out"],
        params["b_out"],
    )                                                    # (M, 1) f32
    pred = pred[:, 0].reshape(B, h, w)

    # F.interpolate(pred, scale_factor=32, mode='bilinear')   [Pallas matmuls]
    mh = bilinear_matrix(H, h)
    mw = bilinear_matrix(W, w)
    up = bilinear_upsample(pred, mh, mw.T)               # (B, H, W)

    return up[:, None, :, :]                             # NCHW (B, 1, H, W)


if __name__ == "__main__":
    key = jax.random.PRNGKey(0)
    x = jax.random.normal(key, (2, 3, 64, 64), jnp.float32)   # NCHW, like PyTorch
    params = init_params()

    out = backbone_forward(x, params)
    out = jax.block_until_ready(out)

    assert out.shape == (2, 1, 64, 64), out.shape
    assert jnp.all(jnp.isfinite(out))
    print("KERNEL_OK")
</pallas_src>

<mosaic_0001>
module attributes {stable_mosaic.version = 11 : i64} {
  func.func @_fused_patch_embed_head_kernel(%arg0: i32, %arg1: i32, %arg2: memref<8x1024xbf16, #tpu.memory_space<vmem>>, %arg3: memref<1024x512xbf16, #tpu.memory_space<vmem>>, %arg4: memref<1x512xf32, #tpu.memory_space<vmem>>, %arg5: memref<512x128xbf16, #tpu.memory_space<vmem>>, %arg6: memref<1x128xf32, #tpu.memory_space<vmem>>, %arg7: memref<8x128xf32, #tpu.memory_space<vmem>>, %arg8: memref<8x512xf32, #tpu.memory_space<vmem>>) attributes {dimension_semantics = [#tpu.dimension_semantics<parallel>, #tpu.dimension_semantics<arbitrary>], iteration_bounds = array<i64: 1, 3>, scalar_prefetch = 0 : i64, scratch_operands = 1 : i64, tpu.core_type = #tpu.core_type<tc>, window_params = [{transform_indices = @transform_0, window_bounds = array<i64: 8, 1024>}, {transform_indices = @transform_1, window_bounds = array<i64: 1024, 512>}, {pipeline_mode = #tpu.pipeline_mode<synchronous>, transform_indices = @transform_2, window_bounds = array<i64: 1, 512>}, {pipeline_mode = #tpu.pipeline_mode<synchronous>, transform_indices = @transform_3, window_bounds = array<i64: 512, 128>}, {pipeline_mode = #tpu.pipeline_mode<synchronous>, transform_indices = @transform_4, window_bounds = array<i64: 1, 128>}, {transform_indices = @transform_5, window_bounds = array<i64: 8, 128>}]} {
    %c0_i32 = arith.constant 0 : i32
    %0 = arith.cmpi eq, %arg1, %c0_i32 : i32
    %1 = arith.extui %0 : i1 to i32
    %c0_i32_0 = arith.constant 0 : i32
    %2 = arith.cmpi ne, %1, %c0_i32_0 : i32
    scf.if %2 {
      %cst_9 = arith.constant 0.000000e+00 : f32
      %12 = vector.broadcast %cst_9 : f32 to vector<8x512xf32>
      %c0_10 = arith.constant 0 : index
      %c0_11 = arith.constant 0 : index
      %13 = vector.load %arg8[%c0_10, %c0_11] : memref<8x512xf32, #tpu.memory_space<vmem>>, vector<8x512xf32>
      tpu.vector_store %arg8[%c0_10, %c0_11], %12 {strides = array<i32>} : memref<8x512xf32, #tpu.memory_space<vmem>>, vector<8x512xf32>,
    } else {
    }
    %c0 = arith.constant 0 : index
    %c0_1 = arith.constant 0 : index
    %3 = vector.load %arg8[%c0, %c0_1] : memref<8x512xf32, #tpu.memory_space<vmem>>, vector<8x512xf32>
    %c0_2 = arith.constant 0 : index
    %c0_3 = arith.constant 0 : index
    %4 = vector.load %arg2[%c0_2, %c0_3] : memref<8x1024xbf16, #tpu.memory_space<vmem>>, vector<8x1024xbf16>
    %c0_4 = arith.constant 0 : index
    %c0_5 = arith.constant 0 : index
    %5 = vector.load %arg3[%c0_4, %c0_5] : memref<1024x512xbf16, #tpu.memory_space<vmem>>, vector<1024x512xbf16>
    %cst = arith.constant dense<0.000000e+00> : vector<8x512xf32>
    %6 = tpu.matmul %4, %5, %cst {dimension_numbers = #tpu.dot_dimension_numbers<[1], [0], [0], [1], [0, 0, 1, 1], [], []>} : vector<8x1024xbf16>, vector<1024x512xbf16>, vector<8x512xf32> -> vector<8x512xf32>
    %7 = arith.addf %3, %6 : vector<8x512xf32>
    %c0_6 = arith.constant 0 : index
    %c0_7 = arith.constant 0 : index
    %8 = vector.load %arg8[%c0_6, %c0_7] : memref<8x512xf32, #tpu.memory_space<vmem>>, vector<8x512xf32>
    tpu.vector_store %arg8[%c0_6, %c0_7], %7 {strides = array<i32>} : memref<8x512xf32, #tpu.memory_space<vmem>>, vector<8x512xf32>,
    %c2_i32 = arith.constant 2 : i32
    %9 = arith.cmpi eq, %arg1, %c2_i32 : i32
    %10 = arith.extui %9 : i1 to i32
    %c0_i32_8 = arith.constant 0 : i32
    %11 = arith.cmpi ne, %10, %c0_i32_8 : i32
    scf.if %11 {
      %c0_9 = arith.constant 0 : index
      %c0_10 = arith.constant 0 : index
      %12 = vector.load %arg8[%c0_9, %c0_10] : memref<8x512xf32, #tpu.memory_space<vmem>>, vector<8x512xf32>
      %c0_11 = arith.constant 0 : index
      %c0_12 = arith.constant 0 : index
      %13 = vector.load %arg4[%c0_11, %c0_12] : memref<1x512xf32, #tpu.memory_space<vmem>>, vector<1x512xf32>
      %14 = vector.broadcast %13 : vector<1x512xf32> to vector<8x512xf32>
      %15 = arith.addf %12, %14 : vector<8x512xf32>
      %16 = arith.truncf %15 : vector<8x512xf32> to vector<8x512xbf16>
      %c0_13 = arith.constant 0 : index
      %c0_14 = arith.constant 0 : index
      %17 = vector.load %arg5[%c0_13, %c0_14] : memref<512x128xbf16, #tpu.memory_space<vmem>>, vector<512x128xbf16>
      %cst_15 = arith.constant dense<0.000000e+00> : vector<8x128xf32>
      %18 = tpu.matmul %16, %17, %cst_15 {dimension_numbers = #tpu.dot_dimension_numbers<[1], [0], [0], [1], [0, 0, 1, 1], [], []>} : vector<8x512xbf16>, vector<512x128xbf16>, vector<8x128xf32> -> vector<8x128xf32>
      %c0_16 = arith.constant 0 : index
      %c0_17 = arith.constant 0 : index
      %19 = vector.load %arg6[%c0_16, %c0_17] : memref<1x128xf32, #tpu.memory_space<vmem>>, vector<1x128xf32>
      %20 = vector.broadcast %19 : vector<1x128xf32> to vector<8x128xf32>
      %21 = arith.addf %18, %20 : vector<8x128xf32>
      %c0_18 = arith.constant 0 : index
      %c0_19 = arith.constant 0 : index
      %22 = vector.load %arg7[%c0_18, %c0_19] : memref<8x128xf32, #tpu.memory_space<vmem>>, vector<8x128xf32>
      tpu.vector_store %arg7[%c0_18, %c0_19], %21 {strides = array<i32>} : memref<8x128xf32, #tpu.memory_space<vmem>>, vector<8x128xf32>,
    } else {
    }
    return
  }
  func.func @transform_0(%arg0: i32, %arg1: i32) -> (i32, i32) {
    %c0_i32 = arith.constant 0 : i32
    return %arg0, %arg1 : i32, i32
  }
  func.func @transform_1(%arg0: i32, %arg1: i32) -> (i32, i32) {
    %c0_i32 = arith.constant 0 : i32
    %c0_i32_0 = arith.constant 0 : i32
    return %arg1, %c0_i32 : i32, i32
  }
  func.func @transform_2(%arg0: i32, %arg1: i32) -> (i32, i32) {
    %c0_i32 = arith.constant 0 : i32
    %c0_i32_0 = arith.constant 0 : i32
    %c0_i32_1 = arith.constant 0 : i32
    return %c0_i32, %c0_i32_0 : i32, i32
  }
  func.func @transform_3(%arg0: i32, %arg1: i32) -> (i32, i32) {
    %c0_i32 = arith.constant 0 : i32
    %c0_i32_0 = arith.constant 0 : i32
    %c0_i32_1 = arith.constant 0 : i32
    return %c0_i32, %c0_i32_0 : i32, i32
  }
  func.func @transform_4(%arg0: i32, %arg1: i32) -> (i32, i32) {
    %c0_i32 = arith.constant 0 : i32
    %c0_i32_0 = arith.constant 0 : i32
    %c0_i32_1 = arith.constant 0 : i32
    return %c0_i32, %c0_i32_0 : i32, i32
  }
  func.func @transform_5(%arg0: i32, %arg1: i32) -> (i32, i32) {
    %c0_i32 = arith.constant 0 : i32
    %c0_i32_0 = arith.constant 0 : i32
    return %arg0, %c0_i32 : i32, i32
  }
}

module attributes {stable_mosaic.version = 11 : i64} {
  func.func @_bilinear_kernel(%arg0: i32, %arg1: i32, %arg2: memref<1x2x2xf32, #tpu.memory_space<vmem>>, %arg3: memref<64x2xf32, #tpu.memory_space<vmem>>, %arg4: memref<2x64xf32, #tpu.memory_space<vmem>>, %arg5: memref<1x64x64xf32, #tpu.memory_space<vmem>>) attributes {dimension_semantics = [#tpu.dimension_semantics<parallel>, #tpu.dimension_semantics<parallel>], iteration_bounds = array<i64: 2, 1>, scalar_prefetch = 0 : i64, scratch_operands = 0 : i64, tpu.core_type = #tpu.core_type<tc>, window_params = [{transform_indices = @transform_0, window_bounds = array<i64: 1, 2, 2>}, {transform_indices = @transform_1, window_bounds = array<i64: 64, 2>}, {pipeline_mode = #tpu.pipeline_mode<synchronous>, transform_indices = @transform_2, window_bounds = array<i64: 2, 64>}, {transform_indices = @transform_3, window_bounds = array<i64: 1, 64, 64>}]} {
    %c0 = arith.constant 0 : index
    %c0_0 = arith.constant 0 : index
    %c0_1 = arith.constant 0 : index
    %0 = vector.load %arg2[%c0, %c0_0, %c0_1] : memref<1x2x2xf32, #tpu.memory_space<vmem>>, vector<1x2x2xf32>
    %1 = vector.shape_cast %0 : vector<1x2x2xf32> to vector<2x2xf32>
    %c0_2 = arith.constant 0 : index
    %c0_3 = arith.constant 0 : index
    %2 = vector.load %arg3[%c0_2, %c0_3] : memref<64x2xf32, #tpu.memory_space<vmem>>, vector<64x2xf32>
    %cst = arith.constant dense<0.000000e+00> : vector<64x2xf32>
    %3 = tpu.matmul %2, %1, %cst {dimension_numbers = #tpu.dot_dimension_numbers<[1], [0], [0], [1], [0, 0, 1, 1], [], []>} : vector<64x2xf32>, vector<2x2xf32>, vector<64x2xf32> -> vector<64x2xf32>
    %c0_4 = arith.constant 0 : index
    %c0_5 = arith.constant 0 : index
    %4 = vector.load %arg4[%c0_4, %c0_5] : memref<2x64xf32, #tpu.memory_space<vmem>>, vector<2x64xf32>
    %cst_6 = arith.constant dense<0.000000e+00> : vector<64x64xf32>
    %5 = tpu.matmul %3, %4, %cst_6 {dimension_numbers = #tpu.dot_dimension_numbers<[1], [0], [0], [1], [0, 0, 1, 1], [], []>} : vector<64x2xf32>, vector<2x64xf32>, vector<64x64xf32> -> vector<64x64xf32>
    %c0_7 = arith.constant 0 : index
    %c0_8 = arith.constant 0 : index
    %c0_9 = arith.constant 0 : index
    %6 = vector.load %arg5[%c0_7, %c0_8, %c0_9] : memref<1x64x64xf32, #tpu.memory_space<vmem>>, vector<1x64x64xf32>
    %7 = vector.shape_cast %6 : vector<1x64x64xf32> to vector<64x64xf32>
    %8 = vector.shape_cast %5 : vector<64x64xf32> to vector<1x64x64xf32>
    tpu.vector_store %arg5[%c0_7, %c0_8, %c0_9], %8 {strides = array<i32>} : memref<1x64x64xf32, #tpu.memory_space<vmem>>, vector<1x64x64xf32>,
    return
  }
  func.func @transform_0(%arg0: i32, %arg1: i32) -> (i32, i32, i32) {
    %c0_i32 = arith.constant 0 : i32
    %c0_i32_0 = arith.constant 0 : i32
    %c0_i32_1 = arith.constant 0 : i32
    return %arg0, %c0_i32, %c0_i32_0 : i32, i32, i32
  }
  func.func @transform_1(%arg0: i32, %arg1: i32) -> (i32, i32) {
    %c0_i32 = arith.constant 0 : i32
    %c0_i32_0 = arith.constant 0 : i32
    return %arg1, %c0_i32 : i32, i32
  }
  func.func @transform_2(%arg0: i32, %arg1: i32) -> (i32, i32) {
    %c0_i32 = arith.constant 0 : i32
    %c0_i32_0 = arith.constant 0 : i32
    %c0_i32_1 = arith.constant 0 : i32
    return %c0_i32, %c0_i32_0 : i32, i32
  }
  func.func @transform_3(%arg0: i32, %arg1: i32) -> (i32, i32, i32) {
    %c0_i32 = arith.constant 0 : i32
    %c0_i32_0 = arith.constant 0 : i32
    return %arg0, %arg1, %c0_i32 : i32, i32, i32
  }
}

</mosaic_0001>

<bundles_post_ra>
// kernel: backbone_forward.2
= control target key start
LH: loop header
LB: loop body
LE: loop exit
PB: predicated region body
PF: predicated region fallthrough
CT: control target
= control target key end

     0   :  { %s3512_s18 = smov 0   ;;  %s3514_s19 = smov 0   ;;  %s3964_s0 = inlined_call_operand.vmem [shape: bf16[8,3072], index: 0, kind: input, shape index: {}]   ;;  %s3965_s1 = inlined_call_operand.vmem [shape: bf16[3072,512], index: 1, kind: input, shape index: {}]   ;;  %s3966_s2 = inlined_call_operand.vmem [shape: f32[1,512], index: 2, kind: input, shape index: {}]   ;;  %s3967_s3 = inlined_call_operand.vmem [shape: bf16[512,128], index: 3, kind: input, shape index: {}]   ;;  %s3968_s4 = inlined_call_operand.vmem [shape: f32[1,128], index: 4, kind: input, shape index: {}]   ;;  %s3969_s5 = inlined_call_operand.vmem [shape: f32[8,128], index: 5, kind: output, shape index: {}]  }
   0x1   :  { %s3516_s20 = smov 0  }
   0x2 LB: > { %s24_s21 = sadd.s32 1, %s3475_s19  ;;  %p2655_p0 = scmp.ge.s32.totalorder %s3479_s20, 1  ;;  %s3479_s20 = sphi %s3516_s20, %s15_s20   ;;  %s3475_s19 = sphi %s3514_s19, %s3971_s19   ;;  %s3471_s18 = sphi %s3512_s18, %s3970_s18  }
   0x3   : > { %p25_p1 = scmp.ge.s32.totalorder %s24_s21, 3  ;;  %p218_p2 = scmp.lt.s32.totalorder %s3479_s20, 4 }
   0x5   : > { %s3973_s21 = smov (%p25_p1, %s24_s21), 0  ;;  %p219_p3 = pnand %p2655_p0, %p218_p2 }
   0x6   : > { %s2656_s22 = sshll.u32 (!%p219_p3), %s3471_s18, 3  ;;  %s2658_s23 = sshll.u32 (!%p219_p3), %s3471_s18, 7 }
   0x7   : > { %222 = sbr.rel (%p219_p3) target bundleno = 731 (0x2db), region = 40  ;;  %p258_p4 = scmp.lt.s32.totalorder (!%p219_p3), %s2656_s22, 23 }
   0x8   : > { %p266_p5 = scmp.lt.s32.totalorder (!%p219_p3), %s2658_s23, 383  ;;  %p2661_p6 = scmp.ne.s32.totalorder (!%p219_p3), %s3471_s18, 0 }
   0xe   : > { %s3975_s22 = smov (!%p258_p4, %s2656_s22), 23  ;;  %s3977_s23 = smov (!%p266_p5, %s2658_s23), 383 }
   0xf   : > { %s2657_s24 = sshll.u32 %s3975_s22, 2  ;;  %s2963_s28 = sshll.u32 %s3977_s23, 4  ;;  %v3481_v0 = vmov (!%p2661_p6), 0.0  }
  0x10   : > { %s3537_s27 = scalar_lea.vmem %s3964_s0, %s2657_s24  ;;  %s3542_s6 = scalar_lea.vmem %s3965_s1, %s2963_s28  ;;  %281 = vst [vmem:[#allocation2] sm:$0xff] (!%p2661_p6), %v3481_v0  ;;  %282 = vst [vmem:[#allocation2 + $0x8] sm:$0xff] (!%p2661_p6), %v3481_v0 }
  0x11   : > { %280 = sbr.rel (%p2661_p6) target bundleno = 24 (0x18), region = 44  ;;  %283 = vst [vmem:[#allocation2 + $0x10] sm:$0xff] (!%p2661_p6), %v3481_v0  ;;  %284 = vst [vmem:[#allocation2 + $0x18] sm:$0xff] (!%p2661_p6), %v3481_v0 }
  0x18 PF: > { %v3033_v1 = vld [vmem:[%s3542_s6 + $0x4] ss:$16 sps:$4 sm:$0xff]   ;;  %v3037_v3 = vld [vmem:[%s3542_s6] ss:$16 sps:$4 sm:$0xff]   ;;  %v290_v49 = vld [vmem:[%s3537_s27 + $0x8] sm:$0xff]  ;;  %p2926_p7 = scmp.ne.s32.totalorder %s3471_s18, 2 }
  0x19   : > { %v3035_v2 = vld [vmem:[%s3542_s6 + $0x204] ss:$16 sps:$4 sm:$0xff]   ;;  %1857 = vmatprep.subr.bf16.mxu0 %v3033_v1  ;;  %v3038_v4 = vld [vmem:[%s3542_s6 + $0x200] ss:$16 sps:$4 sm:$0xff]   ;;  %v3597_v52 = vcombine.high %v290_v49, %v290_v49 }
  0x1a   : > { %1898 = vmatprep.subr.bf16.mxu1 %v3035_v2  ;;  %v3039_v5 = vld [vmem:[%s3542_s6 + $0x24] ss:$16 sps:$4 sm:$0xff]   ;;  %1858 = vmatpush1.bf16.msra.mxu0 %v3037_v3  ;;  %v3043_v7 = vld [vmem:[%s3542_s6 + $0x20] ss:$16 sps:$4 sm:$0xff]  }
  0x1b   : > { %1899 = vmatpush1.bf16.msra.mxu1 %v3038_v4  ;;  %v3041_v6 = vld [vmem:[%s3542_s6 + $0x224] ss:$16 sps:$4 sm:$0xff]   ;;  %1859 = vmatprep.subr.bf16.mxu0 %v3039_v5  ;;  %v3044_v8 = vld [vmem:[%s3542_s6 + $0x220] ss:$16 sps:$4 sm:$0xff]  }
  0x1c   : > { %1900 = vmatprep.subr.bf16.mxu1 %v3041_v6  ;;  %v3045_v9 = vld [vmem:[%s3542_s6 + $0x44] ss:$16 sps:$4 sm:$0xff]   ;;  %v3049_v11 = vld [vmem:[%s3542_s6 + $0x40] ss:$16 sps:$4 sm:$0xff]   ;;  %1930 = vmatprep.mubr.bf16.mxu1 %v3597_v52 }
  0x1d   : > { %v3047_v10 = vld [vmem:[%s3542_s6 + $0x244] ss:$16 sps:$4 sm:$0xff]   ;;  %v3050_v12 = vld [vmem:[%s3542_s6 + $0x240] ss:$16 sps:$4 sm:$0xff]  }
  0x1e   : > { %1860 = vmatpush1.bf16.msra.mxu0 %v3043_v7  ;;  %v3051_v13 = vld [vmem:[%s3542_s6 + $0x64] ss:$16 sps:$4 sm:$0xff]   ;;  %v3055_v15 = vld [vmem:[%s3542_s6 + $0x60] ss:$16 sps:$4 sm:$0xff]  }
  0x1f   : > { %1901 = vmatpush1.bf16.msra.mxu1 %v3044_v8  ;;  %1861 = vmatprep.subr.bf16.mxu0 %v3045_v9  ;;  %v3053_v14 = vld [vmem:[%s3542_s6 + $0x264] ss:$16 sps:$4 sm:$0xff]   ;;  %v3056_v16 = vld [vmem:[%s3542_s6 + $0x260] ss:$16 sps:$4 sm:$0xff]   ;;  %v3621_v8 = vcombine.low %v290_v49, %v290_v49 }
  0x20   : > { %1902 = vmatprep.subr.bf16.mxu1 %v3047_v10  ;;  %v3057_v17 = vld [vmem:[%s3542_s6 + $0x84] ss:$16 sps:$4 sm:$0xff]   ;;  %v3061_v19 = vld [vmem:[%s3542_s6 + $0x80] ss:$16 sps:$4 sm:$0xff]  }
  0x21   : > { %v3059_v18 = vld [vmem:[%s3542_s6 + $0x284] ss:$16 sps:$4 sm:$0xff]   ;;  %v3062_v20 = vld [vmem:[%s3542_s6 + $0x280] ss:$16 sps:$4 sm:$0xff]  }
  0x22   : > { %1862 = vmatpush1.bf16.msra.mxu0 %v3049_v11  ;;  %v3063_v21 = vld [vmem:[%s3542_s6 + $0xa4] ss:$16 sps:$4 sm:$0xff]   ;;  %v3067_v23 = vld [vmem:[%s3542_s6 + $0xa0] ss:$16 sps:$4 sm:$0xff]  }
  0x23   : > { %1903 = vmatpush1.bf16.msra.mxu1 %v3050_v12  ;;  %1863 = vmatprep.subr.bf16.mxu0 %v3051_v13  ;;  %v3065_v22 = vld [vmem:[%s3542_s6 + $0x2a4] ss:$16 sps:$4 sm:$0xff]   ;;  %v3068_v24 = vld [vmem:[%s3542_s6 + $0x2a0] ss:$16 sps:$4 sm:$0xff]  }
  0x24   : > { %1904 = vmatprep.subr.bf16.mxu1 %v3053_v14  ;;  %v3069_v25 = vld [vmem:[%s3542_s6 + $0xc4] ss:$16 sps:$4 sm:$0xff]   ;;  %v3073_v27 = vld [vmem:[%s3542_s6 + $0xc0] ss:$16 sps:$4 sm:$0xff]  }
  0x25   : > { %v3071_v26 = vld [vmem:[%s3542_s6 + $0x2c4] ss:$16 sps:$4 sm:$0xff]   ;;  %v3074_v28 = vld [vmem:[%s3542_s6 + $0x2c0] ss:$16 sps:$4 sm:$0xff]  }
  0x26   : > { %1864 = vmatpush1.bf16.msra.mxu0 %v3055_v15  ;;  %v3075_v29 = vld [vmem:[%s3542_s6 + $0xe4] ss:$16 sps:$4 sm:$0xff]   ;;  %v3079_v31 = vld [vmem:[%s3542_s6 + $0xe0] ss:$16 sps:$4 sm:$0xff]  }
  0x27   : > { %1905 = vmatpush1.bf16.msra.mxu1 %v3056_v16  ;;  %1865 = vmatprep.subr.bf16.mxu0 %v3057_v17  ;;  %v3077_v30 = vld [vmem:[%s3542_s6 + $0x2e4] ss:$16 sps:$4 sm:$0xff]   ;;  %v3080_v32 = vld [vmem:[%s3542_s6 + $0x2e0] ss:$16 sps:$4 sm:$0xff]  }
  0x28   : > { %1906 = vmatprep.subr.bf16.mxu1 %v3059_v18  ;;  %v3081_v33 = vld [vmem:[%s3542_s6 + $0x104] ss:$16 sps:$4 sm:$0xff]   ;;  %v3085_v35 = vld [vmem:[%s3542_s6 + $0x100] ss:$16 sps:$4 sm:$0xff]  }
  0x29   : > { %v3083_v34 = vld [vmem:[%s3542_s6 + $0x304] ss:$16 sps:$4 sm:$0xff]   ;;  %v3086_v36 = vld [vmem:[%s3542_s6 + $0x300] ss:$16 sps:$4 sm:$0xff]  }
  0x2a   : > { %1866 = vmatpush1.bf16.msra.mxu0 %v3061_v19  ;;  %v3087_v37 = vld [vmem:[%s3542_s6 + $0x124] ss:$16 sps:$4 sm:$0xff]   ;;  %v3091_v39 = vld [vmem:[%s3542_s6 + $0x120] ss:$16 sps:$4 sm:$0xff]  }
  0x2b   : > { %1907 = vmatpush1.bf16.msra.mxu1 %v3062_v20  ;;  %1867 = vmatprep.subr.bf16.mxu0 %v3063_v21  ;;  %v3089_v38 = vld [vmem:[%s3542_s6 + $0x324] ss:$16 sps:$4 sm:$0xff]   ;;  %v3092_v40 = vld [vmem:[%s3542_s6 + $0x320] ss:$16 sps:$4 sm:$0xff]  }
  0x2c   : > { %1908 = vmatprep.subr.bf16.mxu1 %v3065_v22  ;;  %v3093_v41 = vld [vmem:[%s3542_s6 + $0x144] ss:$16 sps:$4 sm:$0xff]   ;;  %v3097_v43 = vld [vmem:[%s3542_s6 + $0x140] ss:$16 sps:$4 sm:$0xff]  }
  0x2d   : > { %v3095_v42 = vld [vmem:[%s3542_s6 + $0x344] ss:$16 sps:$4 sm:$0xff]   ;;  %v3098_v44 = vld [vmem:[%s3542_s6 + $0x340] ss:$16 sps:$4 sm:$0xff]  }
  0x2e   : > { %1868 = vmatpush1.bf16.msra.mxu0 %v3067_v23  ;;  %v3099_v45 = vld [vmem:[%s3542_s6 + $0x164] ss:$16 sps:$4 sm:$0xff]   ;;  %v3103_v50 = vld [vmem:[%s3542_s6 + $0x160] ss:$16 sps:$4 sm:$0xff]  }
  0x2f   : > { %1909 = vmatpush1.bf16.msra.mxu1 %v3068_v24  ;;  %1869 = vmatprep.subr.bf16.mxu0 %v3069_v25  ;;  %v3101_v46 = vld [vmem:[%s3542_s6 + $0x364] ss:$16 sps:$4 sm:$0xff]   ;;  %v3104_v51 = vld [vmem:[%s3542_s6 + $0x360] ss:$16 sps:$4 sm:$0xff]  }
  0x30   : > { %1910 = vmatprep.subr.bf16.mxu1 %v3071_v26  ;;  %v289_v47 = vld [vmem:[%s3537_s27] sm:$0xff] }
  0x31   : > { %v3592_v48 = vcombine.high %v289_v47, %v289_v47  ;;  %v3105_v53 = vld [vmem:[%s3542_s6 + $0x184] ss:$16 sps:$4 sm:$0xff]   ;;  %v3109_v55 = vld [vmem:[%s3542_s6 + $0x180] ss:$16 sps:$4 sm:$0xff]   ;;  %v3619_v7 = vcombine.low %v289_v47, %v289_v47 }
  0x32   : > { %1870 = vmatpush1.bf16.msra.mxu0 %v3073_v27  ;;  %v3107_v54 = vld [vmem:[%s3542_s6 + $0x384] ss:$16 sps:$4 sm:$0xff]   ;;  %v3110_v56 = vld [vmem:[%s3542_s6 + $0x380] ss:$16 sps:$4 sm:$0xff]  }
  0x33   : > { %1911 = vmatpush1.bf16.msra.mxu1 %v3074_v28  ;;  %1871 = vmatprep.subr.bf16.mxu0 %v3075_v29  ;;  %v3111_v57 = vld [vmem:[%s3542_s6 + $0x1a4] ss:$16 sps:$4 sm:$0xff]   ;;  %v3115_v59 = vld [vmem:[%s3542_s6 + $0x1a0] ss:$16 sps:$4 sm:$0xff]  }
  0x34   : > { %1912 = vmatprep.subr.bf16.mxu1 %v3077_v30  ;;  %1889 = vmatprep.mubr.bf16.mxu0 %v3592_v48  ;;  %v3113_v58 = vld [vmem:[%s3542_s6 + $0x3a4] ss:$16 sps:$4 sm:$0xff]   ;;  %v3116_v60 = vld [vmem:[%s3542_s6 + $0x3a0] ss:$16 sps:$4 sm:$0xff]  }
  0x35   : > { %v3117_v61 = vld [vmem:[%s3542_s6 + $0x1c4] ss:$16 sps:$4 sm:$0xff]   ;;  %v3121_v63 = vld [vmem:[%s3542_s6 + $0x1c0] ss:$16 sps:$4 sm:$0xff]  }
  0x36   : > { %1872 = vmatpush1.bf16.msra.mxu0 %v3079_v31  ;;  %v3119_v62 = vld [vmem:[%s3542_s6 + $0x3c4] ss:$16 sps:$4 sm:$0xff]   ;;  %v3122_v0 = vld [vmem:[%s3542_s6 + $0x3c0] ss:$16 sps:$4 sm:$0xff]  }
  0x37   : > { %1913 = vmatpush1.bf16.msra.mxu1 %v3080_v32  ;;  %1873 = vmatprep.subr.bf16.mxu0 %v3081_v33  ;;  %v3123_v1 = vld [vmem:[%s3542_s6 + $0x1e4] ss:$16 sps:$4 sm:$0xff]   ;;  %v3127_v3 = vld [vmem:[%s3542_s6 + $0x1e0] ss:$16 sps:$4 sm:$0xff]  }
  0x38   : > { %1914 = vmatprep.subr.bf16.mxu1 %v3083_v34  ;;  %v3125_v2 = vld [vmem:[%s3542_s6 + $0x3e4] ss:$16 sps:$4 sm:$0xff]   ;;  %v3128_v4 = vld [vmem:[%s3542_s6 + $0x3e0] ss:$16 sps:$4 sm:$0xff]   ;;  %v3653_v34 = vld [vmem:[%s3537_s27 + $0x18] sm:$0xff] }
  0x39   : > { %v3135_v5 = vld [vmem:[%s3542_s6 + $0x404] ss:$16 sps:$4 sm:$0xff]   ;;  %v3133_v9 = vld [vmem:[%s3542_s6 + $0x400] ss:$16 sps:$4 sm:$0xff]  }
  0x3a   : > { %1874 = vmatpush1.bf16.msra.mxu0 %v3085_v35  ;;  %v3138_v6 = vld [vmem:[%s3542_s6 + $0x604] ss:$16 sps:$4 sm:$0xff]   ;;  %v3136_v10 = vld [vmem:[%s3542_s6 + $0x600] ss:$16 sps:$4 sm:$0xff]  }
  0x3b   : > { %1915 = vmatpush1.bf16.msra.mxu1 %v3086_v36  ;;  %1875 = vmatprep.subr.bf16.mxu0 %v3087_v37  ;;  %v3141_v11 = vld [vmem:[%s3542_s6 + $0x424] ss:$16 sps:$4 sm:$0xff]   ;;  %v3139_v13 = vld [vmem:[%s3542_s6 + $0x420] ss:$16 sps:$4 sm:$0xff]  }
  0x3c   : > { %1916 = vmatprep.subr.bf16.mxu1 %v3089_v38  ;;  %v3144_v12 = vld [vmem:[%s3542_s6 + $0x624] ss:$16 sps:$4 sm:$0xff]   ;;  %v3142_v14 = vld [vmem:[%s3542_s6 + $0x620] ss:$16 sps:$4 sm:$0xff]   ;;  %v3663_v38 = vcombine.high %v3653_v34, %v3653_v34 }
  0x3d   : > { %v3147_v15 = vld [vmem:[%s3542_s6 + $0x444] ss:$16 sps:$4 sm:$0xff]   ;;  %v3145_v17 = vld [vmem:[%s3542_s6 + $0x440] ss:$16 sps:$4 sm:$0xff]  }
  0x3e   : > { %1876 = vmatpush1.bf16.msra.mxu0 %v3091_v39  ;;  %v3150_v16 = vld [vmem:[%s3542_s6 + $0x644] ss:$16 sps:$4 sm:$0xff]   ;;  %v3148_v18 = vld [vmem:[%s3542_s6 + $0x640] ss:$16 sps:$4 sm:$0xff]  }
  0x3f   : > { %1917 = vmatpush1.bf16.msra.mxu1 %v3092_v40  ;;  %1877 = vmatprep.subr.bf16.mxu0 %v3093_v41  ;;  %v3153_v19 = vld [vmem:[%s3542_s6 + $0x464] ss:$16 sps:$4 sm:$0xff]   ;;  %v3151_v21 = vld [vmem:[%s3542_s6 + $0x460] ss:$16 sps:$4 sm:$0xff]  }
  0x40   : > { %1918 = vmatprep.subr.bf16.mxu1 %v3095_v42  ;;  %v3156_v20 = vld [vmem:[%s3542_s6 + $0x664] ss:$16 sps:$4 sm:$0xff]   ;;  %v3154_v22 = vld [vmem:[%s3542_s6 + $0x660] ss:$16 sps:$4 sm:$0xff]  }
  0x41   : > { %v3159_v23 = vld [vmem:[%s3542_s6 + $0x484] ss:$16 sps:$4 sm:$0xff]   ;;  %v3157_v25 = vld [vmem:[%s3542_s6 + $0x480] ss:$16 sps:$4 sm:$0xff]  }
  0x42   : > { %1878 = vmatpush1.bf16.msra.mxu0 %v3097_v43  ;;  %v3162_v24 = vld [vmem:[%s3542_s6 + $0x684] ss:$16 sps:$4 sm:$0xff]   ;;  %v3160_v26 = vld [vmem:[%s3542_s6 + $0x680] ss:$16 sps:$4 sm:$0xff]  }
  0x43   : > { %1919 = vmatpush1.bf16.msra.mxu1 %v3098_v44  ;;  %1879 = vmatprep.subr.bf16.mxu0 %v3099_v45  ;;  %v3165_v27 = vld [vmem:[%s3542_s6 + $0x4a4] ss:$16 sps:$4 sm:$0xff]   ;;  %v3163_v29 = vld [vmem:[%s3542_s6 + $0x4a0] ss:$16 sps:$4 sm:$0xff]  }
  0x44   : > { %1920 = vmatprep.subr.bf16.mxu1 %v3101_v46  ;;  %v3168_v28 = vld [vmem:[%s3542_s6 + $0x6a4] ss:$16 sps:$4 sm:$0xff]   ;;  %v3166_v30 = vld [vmem:[%s3542_s6 + $0x6a0] ss:$16 sps:$4 sm:$0xff]  }
  0x45   : > { %v3171_v31 = vld [vmem:[%s3542_s6 + $0x4c4] ss:$16 sps:$4 sm:$0xff]   ;;  %v3169_v35 = vld [vmem:[%s3542_s6 + $0x4c0] ss:$16 sps:$4 sm:$0xff]  }
  0x46   : > { %1880 = vmatpush1.bf16.msra.mxu0 %v3103_v50  ;;  %v3174_v32 = vld [vmem:[%s3542_s6 + $0x6c4] ss:$16 sps:$4 sm:$0xff]   ;;  %v3172_v36 = vld [vmem:[%s3542_s6 + $0x6c0] ss:$16 sps:$4 sm:$0xff]  }
  0x47   : > { %1921 = vmatpush1.bf16.msra.mxu1 %v3104_v51  ;;  %1881 = vmatprep.subr.bf16.mxu0 %v3105_v53  ;;  %v3650_v33 = vld [vmem:[%s3537_s27 + $0x10] sm:$0xff] }
  0x48   : > { %1922 = vmatprep.subr.bf16.mxu1 %v3107_v54  ;;  %v3659_v37 = vcombine.high %v3650_v33, %v3650_v33  ;;  %v3177_v39 = vld [vmem:[%s3542_s6 + $0x4e4] ss:$16 sps:$4 sm:$0xff]   ;;  %v3175_v41 = vld [vmem:[%s3542_s6 + $0x4e0] ss:$16 sps:$4 sm:$0xff]  }
  0x49   : > { %v3180_v40 = vld [vmem:[%s3542_s6 + $0x6e4] ss:$16 sps:$4 sm:$0xff]   ;;  %v3178_v42 = vld [vmem:[%s3542_s6 + $0x6e0] ss:$16 sps:$4 sm:$0xff]  }
  0x4a   : > { %1882 = vmatpush1.bf16.msra.mxu0 %v3109_v55  ;;  %v3183_v43 = vld [vmem:[%s3542_s6 + $0x504] ss:$16 sps:$4 sm:$0xff]   ;;  %v3181_v45 = vld [vmem:[%s3542_s6 + $0x500] ss:$16 sps:$4 sm:$0xff]  }
  0x4b   : > { %1923 = vmatpush1.bf16.msra.mxu1 %v3110_v56  ;;  %1883 = vmatprep.subr.bf16.mxu0 %v3111_v57  ;;  %v3186_v44 = vld [vmem:[%s3542_s6 + $0x704] ss:$16 sps:$4 sm:$0xff]   ;;  %v3184_v46 = vld [vmem:[%s3542_s6 + $0x700] ss:$16 sps:$4 sm:$0xff]  }
  0x4c   : > { %1924 = vmatprep.subr.bf16.mxu1 %v3113_v58  ;;  %v3189_v47 = vld [vmem:[%s3542_s6 + $0x524] ss:$16 sps:$4 sm:$0xff]   ;;  %v3187_v50 = vld [vmem:[%s3542_s6 + $0x520] ss:$16 sps:$4 sm:$0xff]  }
  0x4d   : > { %v3192_v49 = vld [vmem:[%s3542_s6 + $0x724] ss:$16 sps:$4 sm:$0xff]   ;;  %v3190_v51 = vld [vmem:[%s3542_s6 + $0x720] ss:$16 sps:$4 sm:$0xff]  }
  0x4e   : > { %1884 = vmatpush1.bf16.msra.mxu0 %v3115_v59  ;;  %v3195_v53 = vld [vmem:[%s3542_s6 + $0x544] ss:$16 sps:$4 sm:$0xff]   ;;  %v3193_v55 = vld [vmem:[%s3542_s6 + $0x540] ss:$16 sps:$4 sm:$0xff]  }
  0x4f   : > { %1925 = vmatpush1.bf16.msra.mxu1 %v3116_v60  ;;  %1885 = vmatprep.subr.bf16.mxu0 %v3117_v61  ;;  %v3198_v54 = vld [vmem:[%s3542_s6 + $0x744] ss:$16 sps:$4 sm:$0xff]   ;;  %v3196_v56 = vld [vmem:[%s3542_s6 + $0x740] ss:$16 sps:$4 sm:$0xff]  }
  0x50   : > { %1926 = vmatprep.subr.bf16.mxu1 %v3119_v62  ;;  %v3201_v57 = vld [vmem:[%s3542_s6 + $0x564] ss:$16 sps:$4 sm:$0xff]   ;;  %v3199_v59 = vld [vmem:[%s3542_s6 + $0x560] ss:$16 sps:$4 sm:$0xff]  }
  0x51   : > { %v3204_v58 = vld [vmem:[%s3542_s6 + $0x764] ss:$16 sps:$4 sm:$0xff]   ;;  %v3202_v60 = vld [vmem:[%s3542_s6 + $0x760] ss:$16 sps:$4 sm:$0xff]  }
  0x52   : > { %1886 = vmatpush1.bf16.msra.mxu0 %v3121_v63  ;;  %v3207_v61 = vld [vmem:[%s3542_s6 + $0x584] ss:$16 sps:$4 sm:$0xff]   ;;  %v3205_v63 = vld [vmem:[%s3542_s6 + $0x580] ss:$16 sps:$4 sm:$0xff]  }
  0x53   : > { %1927 = vmatpush1.bf16.msra.mxu1 %v3122_v0  ;;  %1887 = vmatprep.subr.bf16.mxu0 %v3123_v1  ;;  %v3210_v62 = vld [vmem:[%s3542_s6 + $0x784] ss:$16 sps:$4 sm:$0xff]   ;;  %v3208_v0 = vld [vmem:[%s3542_s6 + $0x780] ss:$16 sps:$4 sm:$0xff]  }
  0x54   : > { %1928 = vmatprep.subr.bf16.mxu1 %v3125_v2  ;;  %v3213_v1 = vld [vmem:[%s3542_s6 + $0x5a4] ss:$16 sps:$4 sm:$0xff]  }
  0x55   : > { %v3216_v2 = vld [vmem:[%s3542_s6 + $0x7a4] ss:$16 sps:$4 sm:$0xff]  }
  0x56   : > { %1888 = vmatpush1.bf16.msra.mxu0 %v3127_v3  ;;  %v3211_v3 = vld [vmem:[%s3542_s6 + $0x5a0] ss:$16 sps:$4 sm:$0xff]  }
  0x57   : > { %1929 = vmatpush1.bf16.msra.mxu1 %v3128_v4  ;;  %1939 = vmatprep.subr.bf16.mxu0 %v3135_v5  ;;  %v3214_v4 = vld [vmem:[%s3542_s6 + $0x7a0] ss:$16 sps:$4 sm:$0xff]   ;;  %v3219_v5 = vld [vmem:[%s3542_s6 + $0x5c4] ss:$16 sps:$4 sm:$0xff]  }
  0x58   : > { %1980 = vmatprep.subr.bf16.mxu1 %v3138_v6  ;;  %v3222_v6 = vld [vmem:[%s3542_s6 + $0x7c4] ss:$16 sps:$4 sm:$0xff]  }
  0x59   : > { %1890 = vmatmul.mubr.bf16.vlgmr.msra.gmra.mrb[0].mxu0 %v3619_v7 }
  0x5a   : > { %1931 = vmatmul.mubr.bf16.vlgmr.msra.gmra.mrb[0].mxu1 %v3621_v8  ;;  %1940 = vmatpush1.bf16.msra.mxu0 %v3133_v9  ;;  %v3217_v9 = vld [vmem:[%s3542_s6 + $0x5c0] ss:$16 sps:$4 sm:$0xff]  }
  0x5b   : > { %1981 = vmatpush1.bf16.msra.mxu1 %v3136_v10  ;;  %1941 = vmatprep.subr.bf16.mxu0 %v3141_v11  ;;  %v3220_v10 = vld [vmem:[%s3542_s6 + $0x7c0] ss:$16 sps:$4 sm:$0xff]   ;;  %v3225_v11 = vld [vmem:[%s3542_s6 + $0x5e4] ss:$16 sps:$4 sm:$0xff]  }
  0x5c   : > { %1982 = vmatprep.subr.bf16.mxu1 %v3144_v12  ;;  %1971 = vmatprep.mubr.bf16.mxu0 %v3659_v37  ;;  %v3228_v12 = vld [vmem:[%s3542_s6 + $0x7e4] ss:$16 sps:$4 sm:$0xff]  }
  0x5d   : > { %2012 = vmatprep.mubr.bf16.mxu1 %v3663_v38 }
  0x5e   : > { %1942 = vmatpush1.bf16.msra.mxu0 %v3139_v13  ;;  %v3223_v13 = vld [vmem:[%s3542_s6 + $0x5e0] ss:$16 sps:$4 sm:$0xff]  }
  0x5f   : > { %1983 = vmatpush1.bf16.msra.mxu1 %v3142_v14  ;;  %1943 = vmatprep.subr.bf16.mxu0 %v3147_v15  ;;  %v3226_v14 = vld [vmem:[%s3542_s6 + $0x7e0] ss:$16 sps:$4 sm:$0xff]   ;;  %v3235_v15 = vld [vmem:[%s3542_s6 + $0xc] ss:$16 sps:$4 sm:$0xff]  }
  0x60   : > { %1984 = vmatprep.subr.bf16.mxu1 %v3150_v16  ;;  %v3238_v16 = vld [vmem:[%s3542_s6 + $0x20c] ss:$16 sps:$4 sm:$0xff]  }
  0x62   : > { %1944 = vmatpush1.bf16.msra.mxu0 %v3145_v17  ;;  %v3707_v17 = vcombine.low %v3650_v33, %v3650_v33  ;;  %v3257_v33 = vld [vmem:[%s3542_s6 + $0x88] ss:$16 sps:$4 sm:$0xff]  }
  0x63   : > { %1985 = vmatpush1.bf16.msra.mxu1 %v3148_v18  ;;  %1945 = vmatprep.subr.bf16.mxu0 %v3153_v19  ;;  %v3711_v18 = vcombine.low %v3653_v34, %v3653_v34  ;;  %v3233_v19 = vld [vmem:[%s3542_s6 + $0x8] ss:$16 sps:$4 sm:$0xff]  }
  0x64   : > { %1986 = vmatprep.subr.bf16.mxu1 %v3156_v20  ;;  %v3236_v20 = vld [vmem:[%s3542_s6 + $0x208] ss:$16 sps:$4 sm:$0xff]  }
  0x65   : > { %v3260_v34 = vld [vmem:[%s3542_s6 + $0x288] ss:$16 sps:$4 sm:$0xff]  }
  0x66   : > { %1946 = vmatpush1.bf16.msra.mxu0 %v3151_v21  ;;  %v3241_v21 = vld [vmem:[%s3542_s6 + $0x2c] ss:$16 sps:$4 sm:$0xff]  }
  0x67   : > { %1987 = vmatpush1.bf16.msra.mxu1 %v3154_v22  ;;  %1947 = vmatprep.subr.bf16.mxu0 %v3159_v23  ;;  %v3244_v22 = vld [vmem:[%s3542_s6 + $0x22c] ss:$16 sps:$4 sm:$0xff]   ;;  %v3239_v23 = vld [vmem:[%s3542_s6 + $0x28] ss:$16 sps:$4 sm:$0xff]  }
  0x68   : > { %1988 = vmatprep.subr.bf16.mxu1 %v3162_v24  ;;  %v3242_v24 = vld [vmem:[%s3542_s6 + $0x228] ss:$16 sps:$4 sm:$0xff]  }
  0x6a   : > { %1948 = vmatpush1.bf16.msra.mxu0 %v3157_v25  ;;  %v3247_v25 = vld [vmem:[%s3542_s6 + $0x4c] ss:$16 sps:$4 sm:$0xff]  }
  0x6b   : > { %1989 = vmatpush1.bf16.msra.mxu1 %v3160_v26  ;;  %1949 = vmatprep.subr.bf16.mxu0 %v3165_v27  ;;  %v3250_v26 = vld [vmem:[%s3542_s6 + $0x24c] ss:$16 sps:$4 sm:$0xff]   ;;  %v3245_v27 = vld [vmem:[%s3542_s6 + $0x48] ss:$16 sps:$4 sm:$0xff]  }
  0x6c   : > { %1990 = vmatprep.subr.bf16.mxu1 %v3168_v28  ;;  %v3248_v28 = vld [vmem:[%s3542_s6 + $0x248] ss:$16 sps:$4 sm:$0xff]  }
  0x6e   : > { %1950 = vmatpush1.bf16.msra.mxu0 %v3163_v29  ;;  %v3253_v29 = vld [vmem:[%s3542_s6 + $0x6c] ss:$16 sps:$4 sm:$0xff]  }
  0x6f   : > { %1991 = vmatpush1.bf16.msra.mxu1 %v3166_v30  ;;  %1951 = vmatprep.subr.bf16.mxu0 %v3171_v31  ;;  %v3256_v30 = vld [vmem:[%s3542_s6 + $0x26c] ss:$16 sps:$4 sm:$0xff]   ;;  %v3251_v31 = vld [vmem:[%s3542_s6 + $0x68] ss:$16 sps:$4 sm:$0xff]  }
  0x70   : > { %1992 = vmatprep.subr.bf16.mxu1 %v3174_v32  ;;  %v3254_v32 = vld [vmem:[%s3542_s6 + $0x268] ss:$16 sps:$4 sm:$0xff]  }
  0x72   : > { %1952 = vmatpush1.bf16.msra.mxu0 %v3169_v35  ;;  %v3265_v35 = vld [vmem:[%s3542_s6 + $0xac] ss:$16 sps:$4 sm:$0xff]  }
  0x73   : > { %1993 = vmatpush1.bf16.msra.mxu1 %v3172_v36  ;;  %1953 = vmatprep.subr.bf16.mxu0 %v3177_v39  ;;  %v3268_v36 = vld [vmem:[%s3542_s6 + $0x2ac] ss:$16 sps:$4 sm:$0xff]   ;;  %v3263_v39 = vld [vmem:[%s3542_s6 + $0xa8] ss:$16 sps:$4 sm:$0xff]  }
  0x74   : > { %1994 = vmatprep.subr.bf16.mxu1 %v3180_v40  ;;  %v3266_v40 = vld [vmem:[%s3542_s6 + $0x2a8] ss:$16 sps:$4 sm:$0xff]  }
  0x76   : > { %1954 = vmatpush1.bf16.msra.mxu0 %v3175_v41  ;;  %v3271_v41 = vld [vmem:[%s3542_s6 + $0xcc] ss:$16 sps:$4 sm:$0xff]  }
  0x77   : > { %1995 = vmatpush1.bf16.msra.mxu1 %v3178_v42  ;;  %1955 = vmatprep.subr.bf16.mxu0 %v3183_v43  ;;  %v3274_v42 = vld [vmem:[%s3542_s6 + $0x2cc] ss:$16 sps:$4 sm:$0xff]   ;;  %v3269_v43 = vld [vmem:[%s3542_s6 + $0xc8] ss:$16 sps:$4 sm:$0xff]  }
  0x78   : > { %1996 = vmatprep.subr.bf16.mxu1 %v3186_v44  ;;  %v3272_v44 = vld [vmem:[%s3542_s6 + $0x2c8] ss:$16 sps:$4 sm:$0xff]  }
  0x7a   : > { %1956 = vmatpush1.bf16.msra.mxu0 %v3181_v45  ;;  %v3277_v45 = vld [vmem:[%s3542_s6 + $0xec] ss:$16 sps:$4 sm:$0xff]  }
  0x7b   : > { %1997 = vmatpush1.bf16.msra.mxu1 %v3184_v46  ;;  %1957 = vmatprep.subr.bf16.mxu0 %v3189_v47  ;;  %v3280_v46 = vld [vmem:[%s3542_s6 + $0x2ec] ss:$16 sps:$4 sm:$0xff]   ;;  %v3275_v47 = vld [vmem:[%s3542_s6 + $0xe8] ss:$16 sps:$4 sm:$0xff]  }
  0x7c   : > { %1998 = vmatprep.subr.bf16.mxu1 %v3192_v49  ;;  %v3278_v49 = vld [vmem:[%s3542_s6 + $0x2e8] ss:$16 sps:$4 sm:$0xff]  }
  0x7e   : > { %1958 = vmatpush1.bf16.msra.mxu0 %v3187_v50  ;;  %v3283_v50 = vld [vmem:[%s3542_s6 + $0x10c] ss:$16 sps:$4 sm:$0xff]  }
  0x7f   : > { %1999 = vmatpush1.bf16.msra.mxu1 %v3190_v51  ;;  %1959 = vmatprep.subr.bf16.mxu0 %v3195_v53  ;;  %v3286_v51 = vld [vmem:[%s3542_s6 + $0x30c] ss:$16 sps:$4 sm:$0xff]   ;;  %v3281_v53 = vld [vmem:[%s3542_s6 + $0x108] ss:$16 sps:$4 sm:$0xff]  }
  0x80   : > { %2000 = vmatprep.subr.bf16.mxu1 %v3198_v54  ;;  %v3284_v54 = vld [vmem:[%s3542_s6 + $0x308] ss:$16 sps:$4 sm:$0xff]  }
  0x82   : > { %1960 = vmatpush1.bf16.msra.mxu0 %v3193_v55  ;;  %v3289_v55 = vld [vmem:[%s3542_s6 + $0x12c] ss:$16 sps:$4 sm:$0xff]  }
  0x83   : > { %2001 = vmatpush1.bf16.msra.mxu1 %v3196_v56  ;;  %1961 = vmatprep.subr.bf16.mxu0 %v3201_v57  ;;  %v3292_v56 = vld [vmem:[%s3542_s6 + $0x32c] ss:$16 sps:$4 sm:$0xff]   ;;  %v3287_v57 = vld [vmem:[%s3542_s6 + $0x128] ss:$16 sps:$4 sm:$0xff]  }
  0x84   : > { %2002 = vmatprep.subr.bf16.mxu1 %v3204_v58  ;;  %v3290_v58 = vld [vmem:[%s3542_s6 + $0x328] ss:$16 sps:$4 sm:$0xff]  }
  0x86   : > { %1962 = vmatpush1.bf16.msra.mxu0 %v3199_v59  ;;  %v3295_v59 = vld [vmem:[%s3542_s6 + $0x14c] ss:$16 sps:$4 sm:$0xff]  }
  0x87   : > { %2003 = vmatpush1.bf16.msra.mxu1 %v3202_v60  ;;  %1963 = vmatprep.subr.bf16.mxu0 %v3207_v61  ;;  %v3298_v60 = vld [vmem:[%s3542_s6 + $0x34c] ss:$16 sps:$4 sm:$0xff]   ;;  %v3293_v61 = vld [vmem:[%s3542_s6 + $0x148] ss:$16 sps:$4 sm:$0xff]  }
  0x88   : > { %2004 = vmatprep.subr.bf16.mxu1 %v3210_v62  ;;  %v3296_v62 = vld [vmem:[%s3542_s6 + $0x348] ss:$16 sps:$4 sm:$0xff]  }
  0x8a   : > { %1964 = vmatpush1.bf16.msra.mxu0 %v3205_v63  ;;  %v3301_v63 = vld [vmem:[%s3542_s6 + $0x16c] ss:$16 sps:$4 sm:$0xff]  }
  0x8b   : > { %2005 = vmatpush1.bf16.msra.mxu1 %v3208_v0  ;;  %1965 = vmatprep.subr.bf16.mxu0 %v3213_v1  ;;  %v3304_v0 = vld [vmem:[%s3542_s6 + $0x36c] ss:$16 sps:$4 sm:$0xff]   ;;  %v3299_v1 = vld [vmem:[%s3542_s6 + $0x168] ss:$16 sps:$4 sm:$0xff]  }
  0x8c   : > { %2006 = vmatprep.subr.bf16.mxu1 %v3216_v2  ;;  %v3302_v2 = vld [vmem:[%s3542_s6 + $0x368] ss:$16 sps:$4 sm:$0xff]  }
  0x8e   : > { %1966 = vmatpush1.bf16.msra.mxu0 %v3211_v3  ;;  %v3307_v3 = vld [vmem:[%s3542_s6 + $0x18c] ss:$16 sps:$4 sm:$0xff]  }
  0x8f   : > { %2007 = vmatpush1.bf16.msra.mxu1 %v3214_v4  ;;  %1967 = vmatprep.subr.bf16.mxu0 %v3219_v5  ;;  %v3310_v4 = vld [vmem:[%s3542_s6 + $0x38c] ss:$16 sps:$4 sm:$0xff]   ;;  %v3305_v5 = vld [vmem:[%s3542_s6 + $0x188] ss:$16 sps:$4 sm:$0xff]  }
  0x90   : > { %2008 = vmatprep.subr.bf16.mxu1 %v3222_v6  ;;  %v3308_v6 = vld [vmem:[%s3542_s6 + $0x388] ss:$16 sps:$4 sm:$0xff]  }
  0x92   : > { %1968 = vmatpush1.bf16.msra.mxu0 %v3217_v9  ;;  %v3313_v9 = vld [vmem:[%s3542_s6 + $0x1ac] ss:$16 sps:$4 sm:$0xff]  }
  0x93   : > { %2009 = vmatpush1.bf16.msra.mxu1 %v3220_v10  ;;  %1969 = vmatprep.subr.bf16.mxu0 %v3225_v11  ;;  %v3316_v10 = vld [vmem:[%s3542_s6 + $0x3ac] ss:$16 sps:$4 sm:$0xff]   ;;  %v3311_v11 = vld [vmem:[%s3542_s6 + $0x1a8] ss:$16 sps:$4 sm:$0xff]  }
  0x94   : > { %2010 = vmatprep.subr.bf16.mxu1 %v3228_v12  ;;  %v3314_v12 = vld [vmem:[%s3542_s6 + $0x3a8] ss:$16 sps:$4 sm:$0xff]  }
  0x96   : > { %1970 = vmatpush1.bf16.msra.mxu0 %v3223_v13  ;;  %v3319_v13 = vld [vmem:[%s3542_s6 + $0x1cc] ss:$16 sps:$4 sm:$0xff]  }
  0x97   : > { %2011 = vmatpush1.bf16.msra.mxu1 %v3226_v14  ;;  %2021 = vmatprep.subr.bf16.mxu0 %v3235_v15  ;;  %v3322_v14 = vld [vmem:[%s3542_s6 + $0x3cc] ss:$16 sps:$4 sm:$0xff]   ;;  %v3317_v15 = vld [vmem:[%s3542_s6 + $0x1c8] ss:$16 sps:$4 sm:$0xff]  }
  0x98   : > { %2062 = vmatprep.subr.bf16.mxu1 %v3238_v16  ;;  %v3320_v16 = vld [vmem:[%s3542_s6 + $0x3c8] ss:$16 sps:$4 sm:$0xff]  }
  0x99   : > { %1972 = vmatmul.mubr.bf16.vlgmr.msra.gmra.mrb[4].mxu0 %v3707_v17 }
  0x9a   : > { %2013 = vmatmul.mubr.bf16.vlgmr.msra.gmra.mrb[4].mxu1 %v3711_v18  ;;  %2022 = vmatpush1.bf16.msra.mxu0 %v3233_v19  ;;  %v3325_v19 = vld [vmem:[%s3542_s6 + $0x1ec] ss:$16 sps:$4 sm:$0xff]  }
  0x9b   : > { %2063 = vmatpush1.bf16.msra.mxu1 %v3236_v20  ;;  %2023 = vmatprep.subr.bf16.mxu0 %v3241_v21  ;;  %v3328_v20 = vld [vmem:[%s3542_s6 + $0x3ec] ss:$16 sps:$4 sm:$0xff]   ;;  %v3323_v21 = vld [vmem:[%s3542_s6 + $0x1e8] ss:$16 sps:$4 sm:$0xff]  }
  0x9c   : > { %2064 = vmatprep.subr.bf16.mxu1 %v3244_v22  ;;  %2053 = vmatprep.mubr.bf16.mxu0 %v3592_v48  ;;  %v3259_v48 = vld [vmem:[%s3542_s6 + $0x8c] ss:$16 sps:$4 sm:$0xff]   ;;  %v3326_v22 = vld [vmem:[%s3542_s6 + $0x3e8] ss:$16 sps:$4 sm:$0xff]  }
  0x9d   : > { %2094 = vmatprep.mubr.bf16.mxu1 %v3597_v52  ;;  %v3262_v52 = vld [vmem:[%s3542_s6 + $0x28c] ss:$16 sps:$4 sm:$0xff]  }
  0x9e   : > { %2024 = vmatpush1.bf16.msra.mxu0 %v3239_v23  ;;  %v3331_v23 = vld [vmem:[%s3542_s6 + $0x40c] ss:$16 sps:$4 sm:$0xff]  }
  0x9f   : > { %2065 = vmatpush1.bf16.msra.mxu1 %v3242_v24  ;;  %2025 = vmatprep.subr.bf16.mxu0 %v3247_v25  ;;  %v3334_v24 = vld [vmem:[%s3542_s6 + $0x60c] ss:$16 sps:$4 sm:$0xff]   ;;  %v3329_v25 = vld [vmem:[%s3542_s6 + $0x408] ss:$16 sps:$4 sm:$0xff]  }
  0xa0   : > { %2066 = vmatprep.subr.bf16.mxu1 %v3250_v26  ;;  %v3332_v26 = vld [vmem:[%s3542_s6 + $0x608] ss:$16 sps:$4 sm:$0xff]  }
  0xa2   : > { %2026 = vmatpush1.bf16.msra.mxu0 %v3245_v27  ;;  %v3337_v27 = vld [vmem:[%s3542_s6 + $0x42c] ss:$16 sps:$4 sm:$0xff]  }
  0xa3   : > { %2067 = vmatpush1.bf16.msra.mxu1 %v3248_v28  ;;  %2027 = vmatprep.subr.bf16.mxu0 %v3253_v29  ;;  %v3340_v28 = vld [vmem:[%s3542_s6 + $0x62c] ss:$16 sps:$4 sm:$0xff]   ;;  %v3335_v29 = vld [vmem:[%s3542_s6 + $0x428] ss:$16 sps:$4 sm:$0xff]  }
  0xa4   : > { %2068 = vmatprep.subr.bf16.mxu1 %v3256_v30  ;;  %v3338_v30 = vld [vmem:[%s3542_s6 + $0x628] ss:$16 sps:$4 sm:$0xff]  }
  0xa6   : > { %2028 = vmatpush1.bf16.msra.mxu0 %v3251_v31  ;;  %v3343_v31 = vld [vmem:[%s3542_s6 + $0x44c] ss:$16 sps:$4 sm:$0xff]  }
  0xa7   : > { %2069 = vmatpush1.bf16.msra.mxu1 %v3254_v32  ;;  %2029 = vmatprep.subr.bf16.mxu0 %v3259_v48  ;;  %v3346_v32 = vld [vmem:[%s3542_s6 + $0x64c] ss:$16 sps:$4 sm:$0xff]  }
  0xa8   : > { %2070 = vmatprep.subr.bf16.mxu1 %v3262_v52  ;;  %v3349_v48 = vld [vmem:[%s3542_s6 + $0x46c] ss:$16 sps:$4 sm:$0xff]  }
  0xa9   : > { %v3352_v52 = vld [vmem:[%s3542_s6 + $0x66c] ss:$16 sps:$4 sm:$0xff]  }
  0xaa   : > { %2030 = vmatpush1.bf16.msra.mxu0 %v3257_v33  ;;  %v3347_v33 = vld [vmem:[%s3542_s6 + $0x468] ss:$16 sps:$4 sm:$0xff]  }
  0xab   : > { %2071 = vmatpush1.bf16.msra.mxu1 %v3260_v34  ;;  %2031 = vmatprep.subr.bf16.mxu0 %v3265_v35  ;;  %v3358_v34 = vld [vmem:[%s3542_s6 + $0x68c] ss:$16 sps:$4 sm:$0xff]   ;;  %v3353_v35 = vld [vmem:[%s3542_s6 + $0x488] ss:$16 sps:$4 sm:$0xff]  }
  0xac   : > { %2072 = vmatprep.subr.bf16.mxu1 %v3268_v36  ;;  %v3356_v36 = vld [vmem:[%s3542_s6 + $0x688] ss:$16 sps:$4 sm:$0xff]  }
  0xae   : > { %2032 = vmatpush1.bf16.msra.mxu0 %v3263_v39  ;;  %v3361_v39 = vld [vmem:[%s3542_s6 + $0x4ac] ss:$16 sps:$4 sm:$0xff]  }
  0xaf   : > { %2073 = vmatpush1.bf16.msra.mxu1 %v3266_v40  ;;  %2033 = vmatprep.subr.bf16.mxu0 %v3271_v41  ;;  %v3364_v40 = vld [vmem:[%s3542_s6 + $0x6ac] ss:$16 sps:$4 sm:$0xff]   ;;  %v3359_v41 = vld [vmem:[%s3542_s6 + $0x4a8] ss:$16 sps:$4 sm:$0xff]  }
  0xb0   : > { %2074 = vmatprep.subr.bf16.mxu1 %v3274_v42  ;;  %v3362_v42 = vld [vmem:[%s3542_s6 + $0x6a8] ss:$16 sps:$4 sm:$0xff]  }
  0xb2   : > { %2034 = vmatpush1.bf16.msra.mxu0 %v3269_v43  ;;  %v3367_v43 = vld [vmem:[%s3542_s6 + $0x4cc] ss:$16 sps:$4 sm:$0xff]  }
  0xb3   : > { %2075 = vmatpush1.bf16.msra.mxu1 %v3272_v44  ;;  %2035 = vmatprep.subr.bf16.mxu0 %v3277_v45  ;;  %v3370_v44 = vld [vmem:[%s3542_s6 + $0x6cc] ss:$16 sps:$4 sm:$0xff]   ;;  %v3365_v45 = vld [vmem:[%s3542_s6 + $0x4c8] ss:$16 sps:$4 sm:$0xff]  }
  0xb4   : > { %2076 = vmatprep.subr.bf16.mxu1 %v3280_v46  ;;  %v3368_v46 = vld [vmem:[%s3542_s6 + $0x6c8] ss:$16 sps:$4 sm:$0xff]  }
  0xb6   : > { %2036 = vmatpush1.bf16.msra.mxu0 %v3275_v47  ;;  %v3373_v47 = vld [vmem:[%s3542_s6 + $0x4ec] ss:$16 sps:$4 sm:$0xff]  }
  0xb7   : > { %2077 = vmatpush1.bf16.msra.mxu1 %v3278_v49  ;;  %2037 = vmatprep.subr.bf16.mxu0 %v3283_v50  ;;  %v3376_v49 = vld [vmem:[%s3542_s6 + $0x6ec] ss:$16 sps:$4 sm:$0xff]   ;;  %v3371_v50 = vld [vmem:[%s3542_s6 + $0x4e8] ss:$16 sps:$4 sm:$0xff]  }
  0xb8   : > { %2078 = vmatprep.subr.bf16.mxu1 %v3286_v51  ;;  %v3374_v51 = vld [vmem:[%s3542_s6 + $0x6e8] ss:$16 sps:$4 sm:$0xff]  }
  0xba   : > { %2038 = vmatpush1.bf16.msra.mxu0 %v3281_v53  ;;  %v3379_v53 = vld [vmem:[%s3542_s6 + $0x50c] ss:$16 sps:$4 sm:$0xff]  }
  0xbb   : > { %2079 = vmatpush1.bf16.msra.mxu1 %v3284_v54  ;;  %2039 = vmatprep.subr.bf16.mxu0 %v3289_v55  ;;  %v3382_v54 = vld [vmem:[%s3542_s6 + $0x70c] ss:$16 sps:$4 sm:$0xff]   ;;  %v3377_v55 = vld [vmem:[%s3542_s6 + $0x508] ss:$16 sps:$4 sm:$0xff]  }
  0xbc   : > { %2080 = vmatprep.subr.bf16.mxu1 %v3292_v56  ;;  %v3380_v56 = vld [vmem:[%s3542_s6 + $0x708] ss:$16 sps:$4 sm:$0xff]  }
  0xbe   : > { %2040 = vmatpush1.bf16.msra.mxu0 %v3287_v57  ;;  %v3385_v57 = vld [vmem:[%s3542_s6 + $0x52c] ss:$16 sps:$4 sm:$0xff]  }
  0xbf   : > { %2081 = vmatpush1.bf16.msra.mxu1 %v3290_v58  ;;  %2041 = vmatprep.subr.bf16.mxu0 %v3295_v59  ;;  %v3388_v58 = vld [vmem:[%s3542_s6 + $0x72c] ss:$16 sps:$4 sm:$0xff]   ;;  %v3383_v59 = vld [vmem:[%s3542_s6 + $0x528] ss:$16 sps:$4 sm:$0xff]  }
  0xc0   : > { %2082 = vmatprep.subr.bf16.mxu1 %v3298_v60  ;;  %v3386_v60 = vld [vmem:[%s3542_s6 + $0x728] ss:$16 sps:$4 sm:$0xff]  }
  0xc2   : > { %2042 = vmatpush1.bf16.msra.mxu0 %v3293_v61  ;;  %v3391_v61 = vld [vmem:[%s3542_s6 + $0x54c] ss:$16 sps:$4 sm:$0xff]  }
  0xc3   : > { %2083 = vmatpush1.bf16.msra.mxu1 %v3296_v62  ;;  %2043 = vmatprep.subr.bf16.mxu0 %v3301_v63  ;;  %v3394_v62 = vld [vmem:[%s3542_s6 + $0x74c] ss:$16 sps:$4 sm:$0xff]   ;;  %v3389_v63 = vld [vmem:[%s3542_s6 + $0x548] ss:$16 sps:$4 sm:$0xff]  }
  0xc4   : > { %2084 = vmatprep.subr.bf16.mxu1 %v3304_v0  ;;  %v3392_v0 = vld [vmem:[%s3542_s6 + $0x748] ss:$16 sps:$4 sm:$0xff]  }
  0xc6   : > { %2044 = vmatpush1.bf16.msra.mxu0 %v3299_v1  ;;  %v3397_v1 = vld [vmem:[%s3542_s6 + $0x56c] ss:$16 sps:$4 sm:$0xff]  }
  0xc7   : > { %2085 = vmatpush1.bf16.msra.mxu1 %v3302_v2  ;;  %2045 = vmatprep.subr.bf16.mxu0 %v3307_v3  ;;  %v3400_v2 = vld [vmem:[%s3542_s6 + $0x76c] ss:$16 sps:$4 sm:$0xff]   ;;  %v3395_v3 = vld [vmem:[%s3542_s6 + $0x568] ss:$16 sps:$4 sm:$0xff]  }
  0xc8   : > { %2086 = vmatprep.subr.bf16.mxu1 %v3310_v4  ;;  %v3398_v4 = vld [vmem:[%s3542_s6 + $0x768] ss:$16 sps:$4 sm:$0xff]  }
  0xca   : > { %2046 = vmatpush1.bf16.msra.mxu0 %v3305_v5  ;;  %v3403_v5 = vld [vmem:[%s3542_s6 + $0x58c] ss:$16 sps:$4 sm:$0xff]  }
  0xcb   : > { %2087 = vmatpush1.bf16.msra.mxu1 %v3308_v6  ;;  %2047 = vmatprep.subr.bf16.mxu0 %v3313_v9  ;;  %v3406_v6 = vld [vmem:[%s3542_s6 + $0x78c] ss:$16 sps:$4 sm:$0xff]   ;;  %v3401_v9 = vld [vmem:[%s3542_s6 + $0x588] ss:$16 sps:$4 sm:$0xff]  }
  0xcc   : > { %2088 = vmatprep.subr.bf16.mxu1 %v3316_v10  ;;  %v3404_v10 = vld [vmem:[%s3542_s6 + $0x788] ss:$16 sps:$4 sm:$0xff]  }
  0xce   : > { %2048 = vmatpush1.bf16.msra.mxu0 %v3311_v11  ;;  %v3409_v11 = vld [vmem:[%s3542_s6 + $0x5ac] ss:$16 sps:$4 sm:$0xff]  }
  0xcf   : > { %2089 = vmatpush1.bf16.msra.mxu1 %v3314_v12  ;;  %2049 = vmatprep.subr.bf16.mxu0 %v3319_v13  ;;  %v3412_v12 = vld [vmem:[%s3542_s6 + $0x7ac] ss:$16 sps:$4 sm:$0xff]   ;;  %v3407_v13 = vld [vmem:[%s3542_s6 + $0x5a8] ss:$16 sps:$4 sm:$0xff]  }
  0xd0   : > { %2090 = vmatprep.subr.bf16.mxu1 %v3322_v14  ;;  %v3410_v14 = vld [vmem:[%s3542_s6 + $0x7a8] ss:$16 sps:$4 sm:$0xff]  }
  0xd2   : > { %2050 = vmatpush1.bf16.msra.mxu0 %v3317_v15  ;;  %v3415_v15 = vld [vmem:[%s3542_s6 + $0x5cc] ss:$16 sps:$4 sm:$0xff]  }
  0xd3   : > { %2091 = vmatpush1.bf16.msra.mxu1 %v3320_v16  ;;  %2051 = vmatprep.subr.bf16.mxu0 %v3325_v19  ;;  %v3418_v16 = vld [vmem:[%s3542_s6 + $0x7cc] ss:$16 sps:$4 sm:$0xff]   ;;  %v3413_v19 = vld [vmem:[%s3542_s6 + $0x5c8] ss:$16 sps:$4 sm:$0xff]  }
  0xd4   : > { %2092 = vmatprep.subr.bf16.mxu1 %v3328_v20  ;;  %v3416_v20 = vld [vmem:[%s3542_s6 + $0x7c8] ss:$16 sps:$4 sm:$0xff]  }
  0xd6   : > { %2052 = vmatpush1.bf16.msra.mxu0 %v3323_v21  ;;  %v3421_v21 = vld [vmem:[%s3542_s6 + $0x5ec] ss:$16 sps:$4 sm:$0xff]  }
  0xd7   : > { %2093 = vmatpush1.bf16.msra.mxu1 %v3326_v22  ;;  %2103 = vmatprep.subr.bf16.mxu0 %v3331_v23  ;;  %v3424_v22 = vld [vmem:[%s3542_s6 + $0x7ec] ss:$16 sps:$4 sm:$0xff]   ;;  %v3419_v23 = vld [vmem:[%s3542_s6 + $0x5e8] ss:$16 sps:$4 sm:$0xff]  }
  0xd8   : > { %2144 = vmatprep.subr.bf16.mxu1 %v3334_v24  ;;  %v3422_v24 = vld [vmem:[%s3542_s6 + $0x7e8] ss:$16 sps:$4 sm:$0xff]  }
  0xd9   : > { %2054 = vmatmul.mubr.bf16.vlgmr.msra.gmra.mrb[8].mxu0 %v3619_v7  ;;  %v3341_v7 = vld [vmem:[%s3542_s6 + $0x448] ss:$16 sps:$4 sm:$0xff]  }
  0xda   : > { %2095 = vmatmul.mubr.bf16.vlgmr.msra.gmra.mrb[8].mxu1 %v3621_v8  ;;  %2104 = vmatpush1.bf16.msra.mxu0 %v3329_v25  ;;  %v3344_v8 = vld [vmem:[%s3542_s6 + $0x648] ss:$16 sps:$4 sm:$0xff]  }
  0xdb   : > { %2145 = vmatpush1.bf16.msra.mxu1 %v3332_v26  ;;  %2105 = vmatprep.subr.bf16.mxu0 %v3337_v27 }
  0xdc   : > { %2146 = vmatprep.subr.bf16.mxu1 %v3340_v28  ;;  %2135 = vmatprep.mubr.bf16.mxu0 %v3659_v37  ;;  %v3350_v37 = vld [vmem:[%s3542_s6 + $0x668] ss:$16 sps:$4 sm:$0xff]  }
  0xdd   : > { %2176 = vmatprep.mubr.bf16.mxu1 %v3663_v38  ;;  %v3355_v38 = vld [vmem:[%s3542_s6 + $0x48c] ss:$16 sps:$4 sm:$0xff]  }
  0xde   : > { %2106 = vmatpush1.bf16.msra.mxu0 %v3335_v29 }
  0xdf   : > { %2147 = vmatpush1.bf16.msra.mxu1 %v3338_v30  ;;  %2107 = vmatprep.subr.bf16.mxu0 %v3343_v31 }
  0xe0   : > { %2148 = vmatprep.subr.bf16.mxu1 %v3346_v32 }
  0xe2   : > { %2108 = vmatpush1.bf16.msra.mxu0 %v3341_v7 }
  0xe3   : > { %2149 = vmatpush1.bf16.msra.mxu1 %v3344_v8  ;;  %2109 = vmatprep.subr.bf16.mxu0 %v3349_v48 }
  0xe4   : > { %2150 = vmatprep.subr.bf16.mxu1 %v3352_v52 }
  0xe6   : > { %2110 = vmatpush1.bf16.msra.mxu0 %v3347_v33 }
  0xe7   : > { %2151 = vmatpush1.bf16.msra.mxu1 %v3350_v37  ;;  %2111 = vmatprep.subr.bf16.mxu0 %v3355_v38 }
  0xe8   : > { %2152 = vmatprep.subr.bf16.mxu1 %v3358_v34  ;;  %v285_v34 = vld [vmem:[#allocation2] sm:$0xff] }
  0xea   : > { %2112 = vmatpush1.bf16.msra.mxu0 %v3353_v35 }
  0xeb   : > { %2153 = vmatpush1.bf16.msra.mxu1 %v3356_v36  ;;  %2113 = vmatprep.subr.bf16.mxu0 %v3361_v39  ;;  %v286_v39 = vld [vmem:[#allocation2 + $0x8] sm:$0xff] }
  0xec   : > { %2154 = vmatprep.subr.bf16.mxu1 %v3364_v40 }
  0xee   : > { %2114 = vmatpush1.bf16.msra.mxu0 %v3359_v41 }
  0xef   : > { %2155 = vmatpush1.bf16.msra.mxu1 %v3362_v42  ;;  %2115 = vmatprep.subr.bf16.mxu0 %v3367_v43 }
  0xf0   : > { %2156 = vmatprep.subr.bf16.mxu1 %v3370_v44 }
  0xf2   : > { %2116 = vmatpush1.bf16.msra.mxu0 %v3365_v45 }
  0xf3   : > { %2157 = vmatpush1.bf16.msra.mxu1 %v3368_v46  ;;  %2117 = vmatprep.subr.bf16.mxu0 %v3373_v47 }
  0xf4   : > { %2158 = vmatprep.subr.bf16.mxu1 %v3376_v49 }
  0xf6   : > { %2118 = vmatpush1.bf16.msra.mxu0 %v3371_v50 }
  0xf7   : > { %2159 = vmatpush1.bf16.msra.mxu1 %v3374_v51  ;;  %2119 = vmatprep.subr.bf16.mxu0 %v3379_v53 }
  0xf8   : > { %2160 = vmatprep.subr.bf16.mxu1 %v3382_v54 }
  0xfa   : > { %2120 = vmatpush1.bf16.msra.mxu0 %v3377_v55 }
  0xfb   : > { %2161 = vmatpush1.bf16.msra.mxu1 %v3380_v56  ;;  %2121 = vmatprep.subr.bf16.mxu0 %v3385_v57 }
  0xfc   : > { %2162 = vmatprep.subr.bf16.mxu1 %v3388_v58 }
  0xfe   : > { %2122 = vmatpush1.bf16.msra.mxu0 %v3383_v59 }
  0xff   : > { %2163 = vmatpush1.bf16.msra.mxu1 %v3386_v60  ;;  %2123 = vmatprep.subr.bf16.mxu0 %v3391_v61 }
 0x100   : > { %2164 = vmatprep.subr.bf16.mxu1 %v3394_v62  ;;  %v287_v62 = vld [vmem:[#allocation2 + $0x10] sm:$0xff] }
 0x102   : > { %2124 = vmatpush1.bf16.msra.mxu0 %v3389_v63 }
 0x103   : > { %2165 = vmatpush1.bf16.msra.mxu1 %v3392_v0  ;;  %2125 = vmatprep.subr.bf16.mxu0 %v3397_v1 }
 0x104   : > { %2166 = vmatprep.subr.bf16.mxu1 %v3400_v2 }
 0x106   : > { %2126 = vmatpush1.bf16.msra.mxu0 %v3395_v3  ;;  %v288_v3 = vld [vmem:[#allocation2 + $0x18] sm:$0xff] }
 0x107   : > { %2167 = vmatpush1.bf16.msra.mxu1 %v3398_v4  ;;  %2127 = vmatprep.subr.bf16.mxu0 %v3403_v5 }
 0x108   : > { %2168 = vmatprep.subr.bf16.mxu1 %v3406_v6 }
 0x10a   : > { %2128 = vmatpush1.bf16.msra.mxu0 %v3401_v9 }
 0x10b   : > { %2169 = vmatpush1.bf16.msra.mxu1 %v3404_v10  ;;  %2129 = vmatprep.subr.bf16.mxu0 %v3409_v11  ;;  %v3425_v11 = vld [vmem:[%s3967_s3 + $0x40] sm:$0xff] (!%p2926_p7)  }
 0x10c   : > { %2170 = vmatprep.subr.bf16.mxu1 %v3412_v12  ;;  %v3426_v12 = vld [vmem:[%s3967_s3 + $0xc0] sm:$0xff] (!%p2926_p7)  }
 0x10e   : > { %2130 = vmatpush1.bf16.msra.mxu0 %v3407_v13  ;;  %v3427_v13 = vld [vmem:[%s3967_s3] sm:$0xff] (!%p2926_p7)  }
 0x10f   : > { %2171 = vmatpush1.bf16.msra.mxu1 %v3410_v14  ;;  %2131 = vmatprep.subr.bf16.mxu0 %v3415_v15  ;;  %v3428_v14 = vld [vmem:[%s3967_s3 + $0x80] sm:$0xff] (!%p2926_p7)   ;;  %v3429_v15 = vld [vmem:[%s3967_s3 + $0x48] sm:$0xff] (!%p2926_p7)  }
 0x110   : > { %2172 = vmatprep.subr.bf16.mxu1 %v3418_v16  ;;  %v3430_v16 = vld [vmem:[%s3967_s3 + $0xc8] sm:$0xff] (!%p2926_p7)  }
 0x112   : > { %2132 = vmatpush1.bf16.msra.mxu0 %v3413_v19  ;;  %v3431_v19 = vld [vmem:[%s3967_s3 + $0x8] sm:$0xff] (!%p2926_p7)  }
 0x113   : > { %2173 = vmatpush1.bf16.msra.mxu1 %v3416_v20  ;;  %2133 = vmatprep.subr.bf16.mxu0 %v3421_v21  ;;  %v3432_v20 = vld [vmem:[%s3967_s3 + $0x88] sm:$0xff] (!%p2926_p7)   ;;  %v3433_v21 = vld [vmem:[%s3967_s3 + $0x50] sm:$0xff] (!%p2926_p7)  }
 0x114   : > { %2174 = vmatprep.subr.bf16.mxu1 %v3424_v22  ;;  %v3434_v22 = vld [vmem:[%s3967_s3 + $0xd0] sm:$0xff] (!%p2926_p7)  }
 0x116   : > { %2134 = vmatpush1.bf16.msra.mxu0 %v3419_v23  ;;  %v3435_v23 = vld [vmem:[%s3967_s3 + $0x10] sm:$0xff] (!%p2926_p7)  }
 0x117   : > { %2175 = vmatpush1.bf16.msra.mxu1 %v3422_v24  ;;  %2964 = vmatprep.subr.bf16.mxu0 (!%p2926_p7), %v3425_v11  ;;  %v3436_v24 = vld [vmem:[%s3967_s3 + $0x90] sm:$0xff] (!%p2926_p7)  }
 0x118   : > { %2986 = vmatprep.subr.bf16.mxu1 (!%p2926_p7), %v3426_v12 }
 0x119   : > { %2136 = vmatmul.mubr.bf16.vlgmr.msra.gmra.mrb[12].mxu0 %v3707_v17 }
 0x11a   : > { %2177 = vmatmul.mubr.bf16.vlgmr.msra.gmra.mrb[12].mxu1 %v3711_v18  ;;  %2965 = vmatpush3.bf16.msra.mxu0 (!%p2926_p7), %v3427_v13 }
 0x11b   : > { %2987 = vmatpush3.bf16.msra.mxu1 (!%p2926_p7), %v3428_v14  ;;  %2966 = vmatprep.subr.bf16.mxu0 (!%p2926_p7), %v3429_v15 }
 0x11c   : > { %2988 = vmatprep.subr.bf16.mxu1 (!%p2926_p7), %v3430_v16 }
 0x11e   : > { %2967 = vmatpush3.bf16.msra.mxu0 (!%p2926_p7), %v3431_v19 }
 0x11f   : > { %2989 = vmatpush3.bf16.msra.mxu1 (!%p2926_p7), %v3432_v20  ;;  %2968 = vmatprep.subr.bf16.mxu0 (!%p2926_p7), %v3433_v21 }
 0x120   : > { %2990 = vmatprep.subr.bf16.mxu1 (!%p2926_p7), %v3434_v22 }
 0x122   : > { %2969 = vmatpush3.bf16.msra.mxu0 (!%p2926_p7), %v3435_v23 }
 0x123   : > { %2991 = vmatpush3.bf16.msra.mxu1 (!%p2926_p7), %v3436_v24 }
 0x12c   : > { %v1891_v25 = vpop.f32.mrb[0].mxu0 }
 0x12d   : > { %v1932_v26 = vpop.f32.mrb[0].mxu1  ;;  %v1893_v28 = vpop.f32.mrb[1].mxu0 }
 0x12e   : > { %v1933_v27 = vadd.f32 %v1932_v26, %v1891_v25  ;;  %v1934_v29 = vpop.f32.mrb[1].mxu1  ;;  %v1895_v31 = vpop.f32.mrb[2].mxu0  ;;  %v3437_v25 = vld [vmem:[%s3967_s3 + $0x58] sm:$0xff] (!%p2926_p7)  }
 0x12f   : > { %v1935_v30 = vadd.f32 %v1934_v29, %v1893_v28  ;;  %v1936_v32 = vpop.f32.mrb[2].mxu1  ;;  %v1896_v7 = vpop.f32.mrb[3].mxu0  ;;  %v3438_v26 = vld [vmem:[%s3967_s3 + $0xd8] sm:$0xff] (!%p2926_p7)   ;;  %2970 = vmatprep.subr.bf16.mxu0 (!%p2926_p7), %v3437_v25  ;;  %v3441_v29 = vld [vmem:[%s3967_s3 + $0x60] sm:$0xff] (!%p2926_p7)  }
 0x130   : > { %v1937_v8 = vpop.f32.mrb[3].mxu1  ;;  %2992 = vmatprep.subr.bf16.mxu1 (!%p2926_p7), %v3438_v26  ;;  %v3440_v28 = vld [vmem:[%s3967_s3 + $0x98] sm:$0xff] (!%p2926_p7)   ;;  %v3443_v31 = vld [vmem:[%s3967_s3 + $0x20] sm:$0xff] (!%p2926_p7)   ;;  %v2203_v32 = vlaneseq (!%p2926_p7) }
 0x131   : > { %2993 = vmatpush3.bf16.msra.mxu1 (!%p2926_p7), %v3440_v28  ;;  %v3444_v7 = vld [vmem:[%s3967_s3 + $0xa0] sm:$0xff] (!%p2926_p7)   ;;  %v3445_v8 = vld [vmem:[%s3967_s3 + $0x68] sm:$0xff] (!%p2926_p7)  }
 0x16c   : > { %v1973_v48 = vpop.f32.mrb[4].mxu0 }
 0x16d   : > { %v2014_v52 = vpop.f32.mrb[4].mxu1  ;;  %v1974_v33 = vadd.f32 %v1973_v48, %v1933_v27  ;;  %v1975_v37 = vpop.f32.mrb[5].mxu0  ;;  %v3439_v27 = vld [vmem:[%s3967_s3 + $0x18] sm:$0xff] (!%p2926_p7)   ;;  %v3446_v48 = vld [vmem:[%s3967_s3 + $0xe8] sm:$0xff] (!%p2926_p7)  }
 0x16e   : > { %v2016_v38 = vpop.f32.mrb[5].mxu1  ;;  %v1976_v35 = vadd.f32 %v1975_v37, %v1935_v30  ;;  %v1977_v17 = vpop.f32.mrb[6].mxu0  ;;  %2971 = vmatpush3.bf16.msra.mxu0 (!%p2926_p7), %v3439_v27  ;;  %v3442_v30 = vld [vmem:[%s3967_s3 + $0xe0] sm:$0xff] (!%p2926_p7)   ;;  %v3448_v37 = vld [vmem:[%s3967_s3 + $0xa8] sm:$0xff] (!%p2926_p7)  }
 0x16f   : > { %v2018_v36 = vpop.f32.mrb[6].mxu1  ;;  %v2015_v18 = vadd.f32 %v2014_v52, %v1974_v33  ;;  %v1978_v40 = vpop.f32.mrb[7].mxu0  ;;  %2972 = vmatprep.subr.bf16.mxu0 (!%p2926_p7), %v3441_v29  ;;  %2994 = vmatprep.subr.bf16.mxu1 (!%p2926_p7), %v3442_v30  ;;  %v3447_v52 = vld [vmem:[%s3967_s3 + $0x28] sm:$0xff] (!%p2926_p7)   ;;  %v2204_v33 = vshrl.u32 (!%p2926_p7), %v2203_v32, 7 }
 0x170   : > { %v2019_v41 = vpop.f32.mrb[7].mxu1  ;;  %v2017_v42 = vadd.f32 %v2016_v38, %v1976_v35  ;;  %2995 = vmatpush3.bf16.msra.mxu1 (!%p2926_p7), %v3444_v7  ;;  %v3449_v38 = vld [vmem:[%s3967_s3 + $0x70] sm:$0xff] (!%p2926_p7)  }
 0x171   : > { %v2185_v43 = vadd.f32 %v2015_v18, %v285_v34  ;;  %2996 = vmatprep.subr.bf16.mxu1 (!%p2926_p7), %v3446_v48  ;;  %v3450_v34 = vld [vmem:[%s3967_s3 + $0xf0] sm:$0xff] (!%p2926_p7)   ;;  %v2209_v17 = vsub.s32 (!%p2926_p7), 1, %v2204_v33  ;;  %v2217_v18 = vsub.s32 (!%p2926_p7), 3, %v2204_v33  ;;  %v2205_v40 = vsub.s32 (!%p2926_p7), 0, %v2204_v33  ;;  %v3454_v41 = vld [vmem:[%s3967_s3 + $0xf8] sm:$0xff] (!%p2926_p7)  }
 0x172   : > { %v2186_v44 = vadd.f32 %v2017_v42, %v286_v39  ;;  %2973 = vmatpush3.bf16.msra.mxu0 (!%p2926_p7), %v3443_v31  ;;  %v3451_v35 = vld [vmem:[%s3967_s3 + $0x30] sm:$0xff] (!%p2926_p7)   ;;  %v3453_v39 = vld [vmem:[%s3967_s3 + $0x78] sm:$0xff] (!%p2926_p7)   ;;  %v2213_v42 = vsub.s32 (!%p2926_p7), 2, %v2204_v33 }
 0x173   : > { %2189 = vst [vmem:[#allocation2] sm:$0xff] %v2185_v43  ;;  %2974 = vmatprep.subr.bf16.mxu0 (!%p2926_p7), %v3445_v8  ;;  %v3452_v36 = vld [vmem:[%s3967_s3 + $0xb0] sm:$0xff] (!%p2926_p7)   ;;  %v3455_v43 = vld [vmem:[%s3967_s3 + $0x38] sm:$0xff] (!%p2926_p7)  }
 0x174   : > { %2190 = vst [vmem:[#allocation2 + $0x8] sm:$0xff] %v2186_v44  ;;  %2997 = vmatpush3.bf16.msra.mxu1 (!%p2926_p7), %v3448_v37  ;;  %v3456_v44 = vld [vmem:[%s3967_s3 + $0xb8] sm:$0xff] (!%p2926_p7)  }
 0x175   : > { %2998 = vmatprep.subr.bf16.mxu1 (!%p2926_p7), %v3450_v34 }
 0x176   : > { %2975 = vmatpush3.bf16.msra.mxu0 (!%p2926_p7), %v3447_v52 }
 0x177   : > { %2976 = vmatprep.subr.bf16.mxu0 (!%p2926_p7), %v3449_v38 }
 0x178   : > { %2999 = vmatpush3.bf16.msra.mxu1 (!%p2926_p7), %v3452_v36 }
 0x179   : > { %3000 = vmatprep.subr.bf16.mxu1 (!%p2926_p7), %v3454_v41 }
 0x17a   : > { %2977 = vmatpush3.bf16.msra.mxu0 (!%p2926_p7), %v3451_v35 }
 0x17b   : > { %2978 = vmatprep.subr.bf16.mxu0 (!%p2926_p7), %v3453_v39 }
 0x17c   : > { %3001 = vmatpush3.bf16.msra.mxu1 (!%p2926_p7), %v3456_v44 }
 0x17e   : > { %2979 = vmatpush3.bf16.msra.mxu0 (!%p2926_p7), %v3455_v43 }
 0x1ac   : > { %v2055_v45 = vpop.f32.mrb[8].mxu0 }
 0x1ad   : > { %v2096_v46 = vpop.f32.mrb[8].mxu1  ;;  %v2057_v49 = vpop.f32.mrb[9].mxu0 }
 0x1ae   : > { %v2097_v47 = vadd.f32 %v2096_v46, %v2055_v45  ;;  %v2098_v50 = vpop.f32.mrb[9].mxu1  ;;  %v2059_v53 = vpop.f32.mrb[10].mxu0  ;;  %v2198_v45 = vld [vmem:[#allocation2 + $0x8] sm:$0xff] (!%p2926_p7)  ;;  %v2201_v46 = vld [vmem:[%s3966_s2] sm:$0xf] (!%p2926_p7) }
 0x1af   : > { %v2099_v51 = vadd.f32 %v2098_v50, %v2057_v49  ;;  %v2100_v54 = vpop.f32.mrb[10].mxu1  ;;  %v2060_v55 = vpop.f32.mrb[11].mxu0  ;;  %v2210_v49 = vrot.slane (!%p2926_p7), %v2201_v46, %v2209_v17  ;;  %v2218_v50 = vrot.slane (!%p2926_p7), %v2201_v46, %v2217_v18  ;;  %v2206_v53 = vrot.slane (!%p2926_p7), %v2201_v46, %v2205_v40 }
 0x1b0   : > { %v2101_v56 = vpop.f32.mrb[11].mxu1  ;;  %v2214_v55 = vrot.slane (!%p2926_p7), %v2201_v46, %v2213_v42 }
 0x1b1   : > { %v2224_v56 = vadd.f32 (!%p2926_p7), %v2210_v49, %v2198_v45 }
 0x1ec   : > { %v2137_v57 = vpop.f32.mrb[12].mxu0 }
 0x1ed   : > { %v2178_v58 = vpop.f32.mrb[12].mxu1  ;;  %v2138_v59 = vadd.f32 %v2137_v57, %v2097_v47  ;;  %v2139_v60 = vpop.f32.mrb[13].mxu0 }
 0x1ee   : > { %v2180_v61 = vpop.f32.mrb[13].mxu1  ;;  %v2140_v63 = vadd.f32 %v2139_v60, %v2099_v51  ;;  %v2141_v0 = vpop.f32.mrb[14].mxu0  ;;  %2196 = sbr.rel (%p2926_p7) target bundleno = 731 (0x2db), region = 48  ;;  %v2197_v51 = vld [vmem:[#allocation2] sm:$0xff] (!%p2926_p7)  ;;  %v2228_v60 = vpack.c.bf16 (!%p2926_p7), %v2224_v56, %v2224_v56 }
 0x1ef   : > { %v2182_v1 = vpop.f32.mrb[14].mxu1  ;;  %v2179_v2 = vadd.f32 %v2178_v58, %v2138_v59  ;;  %v2142_v4 = vpop.f32.mrb[15].mxu0  ;;  %v2223_v58 = vadd.f32 (!%p2926_p7), %v2206_v53, %v2197_v51 }
 0x1f0   : > { %v2183_v5 = vpop.f32.mrb[15].mxu1  ;;  %v2181_v6 = vadd.f32 %v2180_v61, %v2140_v63  ;;  %2526 = vmatprep.mubr.bf16.mxu0 (!%p2926_p7), %v2228_v60 }
 0x1f1   : > { %v2187_v9 = vadd.f32 %v2179_v2, %v287_v62  ;;  %v2227_v62 = vpack.c.bf16 (!%p2926_p7), %v2223_v58, %v2223_v58  ;;  %v2927_v2 = vld [vmem:[%s3968_s4] ss:$0 sm:$0xff] (!%p2926_p7) }
 0x1f2   : > { %v2188_v10 = vadd.f32 %v2181_v6, %v288_v3 }
 0x1f3   : > { %2191 = vst [vmem:[#allocation2 + $0x10] sm:$0xff] %v2187_v9  ;;  %2527 = vmatmul.mubr.bf16.vlgmr.msra.gmra.mrb[0].mxu0 (!%p2926_p7), %v2227_v62 }
 0x1f4   : > { %2192 = vst [vmem:[#allocation2 + $0x18] sm:$0xff] %v2188_v10 }
 0x1fa   : > { %v2199_v54 = vld [vmem:[#allocation2 + $0x10] sm:$0xff] }
 0x1fb   : > { %v2200_v47 = vld [vmem:[#allocation2 + $0x18] sm:$0xff]  ;;  %v2225_v59 = vadd.f32 %v2214_v55, %v2199_v54 }
 0x1fc   : > { %v2226_v57 = vadd.f32 %v2218_v50, %v2200_v47 }
 0x1fd   : > { %v2229_v63 = vpack.c.bf16 %v2225_v59, %v2225_v59 }
 0x1fe   : > { %v2230_v61 = vpack.c.bf16 %v2226_v57, %v2226_v57 }
 0x200   : > { %2566 = vmatprep.mubr.bf16.mxu1 %v2230_v61 }
 0x201   : > { %2567 = vmatmul.mubr.bf16.vlgmr.msra.gmra.mrb[0].mxu1 %v2229_v63 }
 0x2c6   : > { %v2980_v0 = vpop.f32.mrb[0].mxu0 }
 0x2c7   : > { %v2981_v3 = vpop.f32.mrb[1].mxu0 }
 0x2c8   : > { %v2982_v5 = vadd.f32 %v2981_v3, %v2980_v0  ;;  %v2983_v9 = vpop.f32.mrb[2].mxu0 }
 0x2c9   : > { %v2984_v11 = vpop.f32.mrb[3].mxu0 }
 0x2ca   : > { %v2529_v13 = vadd.f32 %v2982_v5, %v2927_v2 }
 0x2d4   : > { %v3002_v1 = vpop.f32.mrb[0].mxu1 }
 0x2d5   : > { %v3003_v4 = vpop.f32.mrb[1].mxu1 }
 0x2d6   : > { %v3004_v6 = vadd.f32 %v3003_v4, %v3002_v1  ;;  %v3005_v10 = vpop.f32.mrb[2].mxu1 }
 0x2d7   : > { %v3006_v12 = vpop.f32.mrb[3].mxu1 }
 0x2d8   : > { %v2569_v14 = vadd.f32 %v3004_v6, %v2529_v13 }
 0x2da   : > { %2574 = vst [vmem:[%s3969_s5] sm:$0xff] %v2569_v14 }
 0x2db PF: > { %s15_s20 = sadd.s32 1, %s3479_s20   ;;  %s3970_s18 = smov %s3475_s19 }
 0x2dc   : > { %p12_p8 = scmp.ge.s32.totalorder %s15_s20, 5   ;;  %s3971_s19 = smov %s3973_s21 }
 0x2de   :  { %14 = sbr.rel (!%p12_p8) target bundleno = 2 (0x2), region = 81 }

// kernel: squeeze.1
= control target key start
LH: loop header
LB: loop body
LE: loop exit
PB: predicated region body
PF: predicated region fallthrough
CT: control target
= control target key end

     0   :  { %vm7_vm0 = vcmask 15360   ;;  %s43_s8 = smov 122   ;;  %s44_s9 = smov 124   ;;  %s68_s0 = inlined_call_operand.vmem [shape: f32[8], index: 0, kind: input, shape index: {}]   ;;  %s69_s1 = inlined_call_operand.vmem [shape: f32[2,2,2], index: 1, kind: output, shape index: {}]  }
   0x1   :  { %v4_v0 = vld [vmem:[%s68_s0] sm:$0x1]  ;;  %s42_s0 = smov 126  }
   0x2   :  { %5 = vst [vmem:[#allocation1] sm:$0x1] %v4_v0 }
   0x9   :  { %v9_v1 = vld [vmem:[#allocation1] sm:$0x1]  }
   0xa   :  { %v21_v2 = vld [vmem:[#allocation1] sm:$0x1]   ;;  %10 = vrot.lane.b32.xlu0 %v9_v1, %s42_s0 }
   0xb   :  { %22 = vrot.lane.b32.xlu1 %v21_v2, %s43_s8  ;;  %v6_v3 = vld [vmem:[#allocation1] sm:$0x1]  }
   0xc   :  { %v15_v4 = vld [vmem:[#allocation1] sm:$0x1]   ;;  %8 = vst.msk [vmem:[#allocation0] sm:$0x1] %vm7_vm0, %v6_v3  }
   0xe   :  { %16 = vrot.lane.b32.xlu0 %v15_v4, %s44_s9 }
  0x7c   :  { %v11_v5 = vpop.permute.xlu0 %10  }
  0x7d   :  { %v23_v6 = vpop.permute.xlu1 %22   ;;  %14 = vst.msk [vmem:[#allocation0 + $0x1] sm:$0x1] %vm7_vm0, %v11_v5  }
  0x7e   :  { %26 = vst.msk [vmem:[#allocation0 + $0x9] sm:$0x1] %vm7_vm0, %v23_v6  }
  0x80   :  { %v17_v7 = vpop.permute.xlu0 %16  }
  0x81   :  { %20 = vst.msk [vmem:[#allocation0 + $0x8] sm:$0x1] %vm7_vm0, %v17_v7  }
  0x84   :  { %v30_v8 = vld [vmem:[#allocation0] sm:$0x3] }
  0x85   :  { %32 = vst [vmem:[%s69_s1] sm:$0x3] %v30_v8 }
  0x88   :  { %v34_v9 = vld [vmem:[#allocation0 + $0x8] sm:$0x3] }
  0x89   :  { %38 = vst [vmem:[%s69_s1 + $0x2] sm:$0x3] %v34_v9 }

// kernel: backbone_forward.3
= control target key start
LH: loop header
LB: loop body
LE: loop exit
PB: predicated region body
PF: predicated region fallthrough
CT: control target
= control target key end

     0   :  { %8 = vsyncpa [#allocation3], 0  ;;  %s1000_s0 = inlined_call_operand.vmem [shape: f32[2,2,2], index: 0, kind: input, shape index: {}]   ;;  %s1001_s1 = inlined_call_operand.vmem [shape: f32[64,2], index: 1, kind: input, shape index: {}]   ;;  %s1002_s2 = inlined_call_operand.vmem [shape: f32[2,64], index: 2, kind: input, shape index: {}]   ;;  %s1003_s3 = inlined_call_operand.hbm [shape: f32[2,64,64], index: 3, kind: output, shape index: {}]  }
   0x1   :  { %10 = vsyncpa [#allocation3 + $0x1], 0  ;;  %s830_s12 = smov 0   ;;  %s832_s13 = smov 0  }
   0x2   :  { %s834_s14 = smov 0   ;;  %s836_s15 = smov 0  }
   0x3   :  { %s838_s16 = smov 0   ;;  %s840_s17 = smov 0  }
   0x4 LB: > { %s592_s18 = sadd.s32 4294967295, %s805_s17   ;;  %s593_s19 = sadd.s32 4294967294, %s805_s17   ;;  %s805_s17 = sphi %s840_s17, %s16_s17   ;;  %s801_s16 = sphi %s838_s16, %s1010_s16   ;;  %s797_s15 = sphi %s836_s15, %s1009_s15   ;;  %s793_s14 = sphi %s834_s14, %s1008_s14   ;;  %s789_s13 = sphi %s832_s13, %s1007_s13   ;;  %s785_s12 = sphi %s830_s12, %s1006_s12  }
   0x5   : > { %s28_s20 = sadd.s32 1, %s801_s16  ;;  %s110_s21 = sadd.s32 1, %s793_s14 }
   0x6   : > { %p30_p0 = scmp.ge.s32.totalorder %s28_s20, 2  ;;  %p120_p1 = scmp.ne.s32.totalorder %s793_s14, %s789_s13 }
   0x7   : > { %p121_p2 = scmp.eq.s32.totalorder %s592_s18, 1  ;;  %p126_p3 = scmp.ne.s32.totalorder %s789_s13, %s785_s12 }
   0x8   : > { %s1012_s20 = smov (%p30_p0, %s28_s20), 0  ;;  %p127_p5 = scmp.eq.s32.totalorder %s593_s19, 1 }
   0x9   : > { %p870_p4 = por %p121_p2, %p120_p1  ;;  %s105_s23 = ssub.s32 %s801_s16, %s1012_s20 }
   0xa   : > { %p597_p6 = scmp.ge.s32.totalorder %s805_s17, 1  ;;  %p108_p7 = scmp.eq.s32.totalorder %s105_s23, 0 }
   0xb   : > { %p877_p8 = por %p127_p5, %p126_p3  ;;  %p164_p9 = scmp.lt.s32.totalorder %s805_s17, 3 }
   0xc   : > { %s883_s25 = scalar_select %p108_p7, %s793_s14, %s110_s21  }
   0xd   : > { %p165_p10 = pnand %p597_p6, %p164_p9 }
   0xe   : > { %p192_p11 = scmp.lt.s32.totalorder (!%p165_p10), %s797_s15, 1  ;;  %v204_v0 = vld [vmem:[%s1001_s1] sm:$0xff] (!%p165_p10)  ;;  %vm212_vm0 = vcmask (!%p165_p10), 15360   ;;  %vm237_vm1 = vcmask (!%p165_p10), 1041408   ;;  %v205_v2 = vld [vmem:[%s1001_s1 + $0x8] sm:$0xff] (!%p165_p10)  ;;  %v206_v3 = vld [vmem:[%s1001_s1 + $0x10] sm:$0xff] (!%p165_p10) }
   0xf   : > { %168 = sbr.rel (%p165_p10) target bundleno = 483 (0x1e3), region = 32  ;;  %644 = vmatprep.mubr.msk.f32.mxu0 (!%p165_p10), %vm212_vm0, %v204_v0  ;;  %v207_v4 = vld [vmem:[%s1001_s1 + $0x18] sm:$0xff] (!%p165_p10)  ;;  %v208_v5 = vld [vmem:[%s1001_s1 + $0x20] sm:$0xff] (!%p165_p10)  ;;  %v209_v6 = vld [vmem:[%s1001_s1 + $0x28] sm:$0xff] (!%p165_p10)  ;;  %vm479_vm2 = vcmask (!%p165_p10), 523264   ;;  %s623_s8 = sshll.u32 (!%p165_p10), %s797_s15, 10 }
  0x10   : > { %v210_v7 = vld [vmem:[%s1001_s1 + $0x30] sm:$0xff] (!%p165_p10)  ;;  %v211_v8 = vld [vmem:[%s1001_s1 + $0x38] sm:$0xff] (!%p165_p10)  ;;  %v346_v9 = vld [vmem:[%s1002_s2] sm:$0x3] (!%p165_p10)  ;;  %s948_s18 = scalar_lea.hbm (!%p165_p10), %s1003_s3, %s623_s8  ;;  %s807_s21 = smov (!%p165_p10), [#allocation2]  }
  0x11   : > { %656 = vmatprep.subr.msk.mxu1 (!%p165_p10), %vm237_vm1, %v346_v9  ;;  %s731_s23 = sshll.u32 (!%p165_p10), %s807_s21, 4  ;;  %s732_s23 = int_to_ptr.vmem [resolvable:$false] %s731_s23 }
  0x12   : > { %657 = vmatpush3.msk.msra.mxu1 (!%p165_p10), %vm237_vm1, %v346_v9  ;;  %s733_s26 = scalar_lea.vmem (!%p165_p10), %s732_s23, 2048 }
  0x16   : > { %s193_s28 = scalar_select %p192_p11, %s797_s15, 1 }
  0x18   : > { %s599_s29 = sshll.u32 %s193_s28, 1 }
  0x19   : > { %s195_s5 = scalar_lea.vmem %s1000_s0, %s599_s29 }
  0x1a   : > { %v203_v1 = vld [vmem:[%s195_s5] sm:$0x3]  ;;  %s189_s5 = sand.u32 1, %s789_s13  }
  0x1b   : > { %642 = vmatprep.subr.msk.mxu0 %vm237_vm1, %v203_v1  ;;  %s598_s6 = sshll.u32 %s189_s5, 6  ;;  %s954_s15 = scalar_lea.sflag [#allocation3], %s189_s5 }
  0x1c   : > { %643 = vmatpush3.msk.msra.mxu0 %vm237_vm1, %v203_v1  ;;  %s191_s7 = scalar_lea.vmem [#allocation2], %s598_s6 }
  0x1d   : > { %645 = vmatmul.mubr.msk.f32.vlgmr.msra.gmra.mrb[0].mxu0 %vm212_vm0, %v205_v2  ;;  %s504_s9 = sshll.u32 %s191_s7, 4  ;;  %s950_s9 = int_to_ptr.vmem [resolvable:$true] %s504_s9 }
  0x1e   : > { %647 = vmatprep.mubr.msk.f32.mxu0 %vm212_vm0, %v206_v3  ;;  %s727_s19 = scalar_lea.vmem %s950_s9, 1024  ;;  %p734_p1 = scmp.lt.s32.totalorder %s950_s9, %s732_s23 }
  0x1f   : > { %p728_p12 = scmp.ne.s32.totalorder %s950_s9, %s727_s19  ;;  %p735_p2 = scmp.lt.s32.totalorder %s733_s26, %s727_s19 }
  0x21   : > { %648 = vmatmul.mubr.msk.f32.gmra.mrb[2].mxu0 %vm212_vm0, %v207_v4  ;;  %p729_p13 = pnand %p728_p12, %p870_p4  ;;  %p736_p3 = por %p735_p2, %p734_p1 }
  0x22   : > { %650 = vmatprep.mubr.msk.f32.mxu0 %vm212_vm0, %v208_v5 }
  0x23   : > { %p730_p0 = pneg %p729_p13 }
  0x25   : > { %651 = vmatmul.mubr.msk.f32.gmra.mrb[4].mxu0 %vm212_vm0, %v209_v6  ;;  %p737_p5 = pnand %p736_p3, %p730_p0 }
  0x26   : > { %653 = vmatprep.mubr.msk.f32.mxu0 %vm212_vm0, %v210_v7 }
  0x29   : > { %654 = vmatmul.mubr.msk.f32.gmra.mrb[6].mxu0 %vm212_vm0, %v211_v8 }
  0xf0   : > { %v646_v10 = vpop.f32.mrb[0].mxu0 }
  0xf1   : > { %v307_v11 = vpop.f32.mrb[1].mxu0 }
  0xf2   : > { %658 = vmatprep.mubr.msk.f32.mxu1 %vm212_vm0, %v307_v11 }
  0xf3   : > { %659 = vmatmul.mubr.msk.f32.vlgmr.msra.gmra.mrb[0].mxu1 %vm212_vm0, %v646_v10 }
  0xf4   : > { %v649_v12 = vpop.f32.mrb[2].mxu0 }
  0xf5   : > { %v317_v13 = vpop.f32.mrb[3].mxu0 }
  0xf6   : > { %661 = vmatprep.mubr.msk.f32.mxu1 %vm212_vm0, %v317_v13 }
  0xf7   : > { %662 = vmatmul.mubr.msk.f32.gmra.mrb[2].mxu1 %vm212_vm0, %v649_v12 }
  0xf8   : > { %v652_v14 = vpop.f32.mrb[4].mxu0 }
  0xf9   : > { %v327_v15 = vpop.f32.mrb[5].mxu0 }
  0xfa   : > { %664 = vmatprep.mubr.msk.f32.mxu1 %vm212_vm0, %v327_v15 }
  0xfb   : > { %665 = vmatmul.mubr.msk.f32.gmra.mrb[4].mxu1 %vm212_vm0, %v652_v14 }
  0xfc   : > { %v655_v16 = vpop.f32.mrb[6].mxu0 }
  0xfd   : > { %v337_v17 = vpop.f32.mrb[7].mxu0 }
  0xfe   : > { %667 = vmatprep.mubr.msk.f32.mxu1 %vm212_vm0, %v337_v17 }
  0xff   : > { %668 = vmatmul.mubr.msk.f32.gmra.mrb[6].mxu1 %vm212_vm0, %v655_v16 }
 0x1c6   : > { %v660_v18 = vpop.f32.mrb[0].mxu1 }
 0x1c7   : > { %481 = vst.msk [vmem:[%s191_s7 + $0x8] sm:$0xff] %vm479_vm2, %v660_v18  ;;  %v440_v19 = vpop.f32.mrb[1].mxu1 }
 0x1c8   : > { %480 = vst.msk [vmem:[%s191_s7] sm:$0xff] %vm479_vm2, %v440_v19 }
 0x1ca   : > { %v663_v20 = vpop.f32.mrb[2].mxu1 }
 0x1cb   : > { %483 = vst.msk [vmem:[%s191_s7 + $0x18] sm:$0xff] %vm479_vm2, %v663_v20  ;;  %v450_v21 = vpop.f32.mrb[3].mxu1 }
 0x1cc   : > { %482 = vst.msk [vmem:[%s191_s7 + $0x10] sm:$0xff] %vm479_vm2, %v450_v21 }
 0x1ce   : > { %v666_v22 = vpop.f32.mrb[4].mxu1 }
 0x1cf   : > { %485 = vst.msk [vmem:[%s191_s7 + $0x28] sm:$0xff] %vm479_vm2, %v666_v22  ;;  %v460_v23 = vpop.f32.mrb[5].mxu1 }
 0x1d0   : > { %484 = vst.msk [vmem:[%s191_s7 + $0x20] sm:$0xff] %vm479_vm2, %v460_v23 }
 0x1d2   : > { %v669_v24 = vpop.f32.mrb[6].mxu1 }
 0x1d3   : > { %487 = vst.msk [vmem:[%s191_s7 + $0x38] sm:$0xff] %vm479_vm2, %v669_v24  ;;  %v470_v25 = vpop.f32.mrb[7].mxu1 }
 0x1d4   : > { %486 = vst.msk [vmem:[%s191_s7 + $0x30] sm:$0xff] %vm479_vm2, %v470_v25 }
 0x1d5   : > { %740 = shalt.err (!%p737_p5)
}
 0x1d6   : > { %s741_s27 = scalar_lea.hbm %s948_s18, 1024  ;;  %s745_s30 = scalar_lea.hbm %s1003_s3, 2048 }
 0x1d7   : > { %p742_p6 = scmp.ne.s32.totalorder %s948_s18, %s741_s27  ;;  %p746_p10 = scmp.lt.u32.totalorder %s948_s18, %s1003_s3 }
 0x1d8   : > { %p747_p11 = scmp.lt.u32.totalorder %s745_s30, %s741_s27  ;;  %p749_p13 = scmp.lt.u32.totalorder %s741_s27, %s948_s18 }
 0x1d9   : > { %p743_p7 = pnand %p742_p6, %p870_p4 }
 0x1da   : > { %p748_p12 = por %p747_p11, %p746_p10 }
 0x1db   : > { %p744_p9 = pneg %p743_p7 }
 0x1dc   : > { %p750_p0 = por %p749_p13, %p748_p12 }
 0x1de   : > { %p751_p1 = pnand %p750_p0, %p744_p9 }
 0x1e0   : > { %754 = shalt.err (!%p751_p1)
}
 0x1e1   : > { %s808_s6 = smov 128   ;;  %s809_s7 = smov 8  }
 0x1e2   : > { %670 = dma.vmem_to_hbm [thread:$0]  (%p870_p4), %s950_s9, 1024, %s948_s18, %s954_s15, %s808_s6, %s808_s6, %s809_s7  }
 0x1e3 PF: > { %p676_p2 = scmp.ge.s32.totalorder %s805_s17, 2  ;;  %s519_s8 = sand.u32 1, %s785_s12  }
 0x1e4   : > { %s520_s10 = scalar_lea.sflag [#allocation3], %s519_s8 }
 0x1e5   : > { %p673_p3 = pnand %p676_p2, %p877_p8 }
 0x1e7   : > { %780 = dma.done.wait (!%p673_p3), %s520_s10, 1024  }
 0x1e8   : > { %782 = vsyncadd (!%p673_p3), %s520_s10, 4294966272  ;;  %s16_s17 = sadd.s32 1, %s805_s17   ;;  %s1006_s12 = smov %s789_s13 }
 0x1e9   : > { %p13_p5 = scmp.ge.s32.totalorder %s16_s17, 4   ;;  %s1007_s13 = smov %s793_s14 }
 0x1ea   : > { %s1008_s14 = smov %s883_s25  ;;  %s1009_s15 = smov %s801_s16 }
 0x1eb   : > { %s1010_s16 = smov %s1012_s20  ;;  %15 = sbr.rel (!%p13_p5) target bundleno = 4 (0x4), region = 70 }
 0x1f2   :  { %525 = vsyncpa [#allocation3], 1 }
 0x1f3   :  { %527 = vsyncpa [#allocation3 + $0x1], 1 }

</bundles_post_ra>
